<compile_context>
chip_gen: v7x
topology: tpu7x:2x2x1
jax: 0.10.0
libtpu: 0.0.40
codegen_flags: <defaults>
</compile_context>

<pallas_src>
import functools

import jax
import jax.numpy as jnp
from jax.experimental import pallas as pl
from jax.experimental.pallas import tpu as pltpu

VMEM = pltpu.MemorySpace.VMEM
BN_EPS = 1e-5
VMEM_LIMIT = 32 * 1024 * 1024  # safe scoped limit on v5e/v6e/v7x


# ----------------------------- Pallas kernels ------------------------------

def _leaky(y):
    return jnp.where(y > 0, y, 0.2 * y)


def _conv_act_kernel(w_ref, cols_ref, o_ref):
    # (Cout, K) @ (K, Mblk) on the MXU, f32 accumulate, fused LeakyReLU.
    acc = jnp.dot(w_ref[...], cols_ref[...], preferred_element_type=jnp.float32)
    o_ref[...] = _leaky(acc).astype(o_ref.dtype)


def _conv_bn_act_kernel(w_ref, cols_ref, g_ref, b_ref, o_ref):
    # GEMM + fused training-mode BatchNorm (biased batch var) + LeakyReLU.
    acc = jnp.dot(w_ref[...], cols_ref[...], preferred_element_type=jnp.float32)
    mean = jnp.mean(acc, axis=1, keepdims=True)                     # (Cout, 1)
    var = jnp.maximum(jnp.mean(acc * acc, axis=1, keepdims=True) - mean * mean,
                      0.0)
    scale = g_ref[...] * jax.lax.rsqrt(var + BN_EPS)
    y = (acc - mean) * scale + b_ref[...]
    o_ref[...] = _leaky(y).astype(o_ref.dtype)


def _tail_kernel(w4_ref, cols_ref, g_ref, b_ref, w5_ref, sel_ref, o_ref):
    # Fused: layer-4 conv GEMM + BN + LeakyReLU, then the final 4x4 valid
    # conv (Cout=1) as an in-VMEM contraction with w5, then Sigmoid.
    acc = jnp.dot(w4_ref[...], cols_ref[...], preferred_element_type=jnp.float32)
    mean = jnp.mean(acc, axis=1, keepdims=True)
    var = jnp.maximum(jnp.mean(acc * acc, axis=1, keepdims=True) - mean * mean,
                      0.0)
    scale = g_ref[...] * jax.lax.rsqrt(var + BN_EPS)
    y = _leaky((acc - mean) * scale + b_ref[...])                   # (C4, B*16)
    prod = y * w5_ref[...]                                          # (C4, B*16)
    colsum = jnp.sum(prod, axis=0, keepdims=True)                   # (1, B*16)
    logits = jnp.dot(colsum, sel_ref[...],
                     preferred_element_type=jnp.float32)            # (1, B)
    o_ref[...] = 1.0 / (1.0 + jnp.exp(-logits))                     # sigmoid


# ------------------------------ Pallas wrappers -----------------------------

def conv_leaky(wmat, cols):
    """Layer-1 style conv GEMM + LeakyReLU. wmat (Cout,K) bf16, cols (K,M) bf16."""
    Cout, K = wmat.shape
    K2, M = cols.shape
    assert K == K2
    out_shape = jax.ShapeDtypeStruct((Cout, M), jnp.bfloat16)

    if M >= 2048 and M % 256 == 0:
        # Exactly two "parallel" blocks: one step per v7x TensorCore, only a
        # single extra (~0.35us) grid step on single-core v5e/v6e.
        bm = M // 2
        return pl.pallas_call(
            _conv_act_kernel,
            out_shape=out_shape,
            grid=(2,),
            in_specs=[pl.BlockSpec((Cout, K), lambda i: (0, 0)),
                      pl.BlockSpec((K, bm), lambda i: (0, i))],
            out_specs=pl.BlockSpec((Cout, bm), lambda i: (0, i)),
            compiler_params=pltpu.CompilerParams(
                dimension_semantics=("parallel",),
                vmem_limit_bytes=VMEM_LIMIT),
        )(wmat, cols)

    return pl.pallas_call(
        _conv_act_kernel,
        out_shape=out_shape,
        in_specs=[pl.BlockSpec(memory_space=VMEM)] * 2,
        out_specs=pl.BlockSpec(memory_space=VMEM),
        compiler_params=pltpu.CompilerParams(vmem_limit_bytes=VMEM_LIMIT),
    )(wmat, cols)


def conv_bn_leaky(wmat, cols, gamma, beta):
    """Conv GEMM + BatchNorm (batch stats) + LeakyReLU, whole-array VMEM block."""
    Cout, K = wmat.shape
    _, M = cols.shape
    return pl.pallas_call(
        _conv_bn_act_kernel,
        out_shape=jax.ShapeDtypeStruct((Cout, M), jnp.bfloat16),
        in_specs=[pl.BlockSpec(memory_space=VMEM)] * 4,
        out_specs=pl.BlockSpec(memory_space=VMEM),
        compiler_params=pltpu.CompilerParams(vmem_limit_bytes=VMEM_LIMIT),
    )(wmat, cols,
      gamma.reshape(Cout, 1).astype(jnp.float32),
      beta.reshape(Cout, 1).astype(jnp.float32))


def tail_fused(w4mat, cols4, gamma, beta, w5, batch):
    """Fused layer-4 conv+BN+LeakyReLU + final 4x4 valid conv + Sigmoid.

    w4mat (C4, K4) bf16, cols4 (K4, batch*16) bf16, w5 (1, C4, 4, 4) f32.
    Returns (1, batch) f32 probabilities.
    """
    Cout4, K4 = w4mat.shape
    _, M4 = cols4.shape
    assert M4 == batch * 16
    w5r = w5.reshape(Cout4, 16).astype(jnp.float32)
    w5full = jnp.tile(w5r, (1, batch))                              # (C4, B*16)
    sel = (jnp.arange(M4)[:, None] // 16
           == jnp.arange(batch)[None, :]).astype(jnp.float32)       # (B*16, B)
    return pl.pallas_call(
        _tail_kernel,
        out_shape=jax.ShapeDtypeStruct((1, batch), jnp.float32),
        in_specs=[pl.BlockSpec(memory_space=VMEM)] * 6,
        out_specs=pl.BlockSpec(memory_space=VMEM),
        compiler_params=pltpu.CompilerParams(vmem_limit_bytes=VMEM_LIMIT),
    )(w4mat, cols4,
      gamma.reshape(Cout4, 1).astype(jnp.float32),
      beta.reshape(Cout4, 1).astype(jnp.float32),
      w5full, sel)


# ------------------------------- JAX glue ----------------------------------

def im2col_cmajor(x, kh, kw, stride, pad):
    """Channel-major im2col. x: (C, N, H, W) -> (C*kh*kw, N*Ho*Wo).

    K index = c*kh*kw + i*kw + j (matches torch weight.reshape(Cout, -1));
    M index = n*Ho*Wo + y*Wo + x, so the GEMM output reshapes straight to
    (Cout, N, Ho, Wo).
    """
    C, N, H, W = x.shape
    if pad:
        x = jnp.pad(x, ((0, 0), (0, 0), (pad, pad), (pad, pad)))
    Hp, Wp = H + 2 * pad, W + 2 * pad
    Ho = (Hp - kh) // stride + 1
    Wo = (Wp - kw) // stride + 1
    patches = []
    for i in range(kh):
        for j in range(kw):
            patches.append(
                x[:, :,
                  i:i + stride * (Ho - 1) + 1:stride,
                  j:j + stride * (Wo - 1) + 1:stride])
    p = jnp.stack(patches, axis=1)                      # (C, kh*kw, N, Ho, Wo)
    return p.reshape(C * kh * kw, N * Ho * Wo), Ho, Wo


def conv_block(x_cm, w, stride, pad, bn=None):
    """Conv2d(bias=False) [+ BatchNorm2d (batch stats)] + LeakyReLU(0.2).

    x_cm: (Cin, N, H, W) channel-major bf16. Returns (Cout, N, Ho, Wo) bf16.
    """
    Cout, _, kh, kw = w.shape
    N = x_cm.shape[1]
    cols, Ho, Wo = im2col_cmajor(x_cm, kh, kw, stride, pad)
    wmat = w.reshape(Cout, -1).astype(jnp.bfloat16)
    if bn is None:
        y = conv_leaky(wmat, cols)
    else:
        y = conv_bn_leaky(wmat, cols, bn[0], bn[1])
    return y.reshape(Cout, N, Ho, Wo)


def init_params(key, features_d, img_ch, num_classes, img_size, embed_size):
    fd = features_d
    ks = jax.random.split(key, 14)

    def w(k, shape, scale=0.05):
        return (scale * jax.random.normal(k, shape)).astype(jnp.float32)

    return dict(
        embed_table=w(ks[0], (num_classes, embed_size), 1.0),
        lin_w=w(ks[1], (embed_size, img_size * img_size), 0.1),  # stored (in, out)
        lin_b=w(ks[2], (img_size * img_size,), 0.1),
        w1=w(ks[3], (fd, img_ch + 1, 4, 4)),
        w2=w(ks[4], (fd * 2, fd, 4, 4)),
        w3=w(ks[5], (fd * 4, fd * 2, 4, 4)),
        w4=w(ks[6], (fd * 8, fd * 4, 4, 4)),
        w5=w(ks[7], (1, fd * 8, 4, 4)),
        g2=1.0 + w(ks[8], (fd * 2,)), b2=w(ks[9], (fd * 2,)),
        g3=1.0 + w(ks[10], (fd * 4,)), b3=w(ks[11], (fd * 4,)),
        g4=1.0 + w(ks[12], (fd * 8,)), b4=w(ks[13], (fd * 8,)),
    )


@functools.partial(jax.jit, static_argnames=("img_size",))
def discriminator_forward(params, x, labels, img_size):
    B = x.shape[0]
    # TODO(synk): embedding gather + the tiny (M=B) Linear stay in XLA — a
    # degenerate M=2 GEMM in Pallas is pure launch/DMA overhead.
    emb = params["embed_table"][labels]                           # (B, embed)
    lin = emb @ params["lin_w"] + params["lin_b"][None, :]        # (B, H*W)
    emb_img = lin.reshape(B, 1, img_size, img_size)
    h = jnp.concatenate([x, emb_img], axis=1)                     # (B, C+1, H, W)
    h = jnp.transpose(h, (1, 0, 2, 3)).astype(jnp.bfloat16)       # channel-major

    h = conv_block(h, params["w1"], 2, 1, bn=None)                       # fd
    h = conv_block(h, params["w2"], 2, 1, bn=(params["g2"], params["b2"]))  # fd*2
    h = conv_block(h, params["w3"], 2, 1, bn=(params["g3"], params["b3"]))  # fd*4

    # Layer 4 (conv+BN+leaky) + final 4x4 valid conv + Sigmoid: one kernel.
    Cout4 = params["w4"].shape[0]
    cols4, Ho4, Wo4 = im2col_cmajor(h, 4, 4, 2, 1)
    assert Ho4 == 4 and Wo4 == 4, (Ho4, Wo4)
    w4mat = params["w4"].reshape(Cout4, -1).astype(jnp.bfloat16)
    probs = tail_fused(w4mat, cols4, params["g4"], params["b4"],
                       params["w5"], B)                            # (1, B)
    return probs.T.reshape(B, 1, 1, 1)


if __name__ == "__main__":
    # 4 stride-2 convs + a 4x4 valid conv require img_size = 64
    # (64 -> 32 -> 16 -> 8 -> 4 -> 1).
    B, IMG_CH, FEATURES_D, NUM_CLASSES, IMG_SIZE, EMBED = 2, 3, 8, 10, 64, 16

    key = jax.random.PRNGKey(0)
    kx, kl, kp = jax.random.split(key, 3)
    x = jax.random.normal(kx, (B, IMG_CH, IMG_SIZE, IMG_SIZE), jnp.float32)
    labels = jax.random.randint(kl, (B,), 0, NUM_CLASSES)
    params = init_params(kp, FEATURES_D, IMG_CH, NUM_CLASSES, IMG_SIZE, EMBED)

    out = discriminator_forward(params, x, labels, IMG_SIZE)
    out = jax.block_until_ready(out)

    assert out.shape == (B, 1, 1, 1), out.shape
    assert bool(jnp.all((out >= 0.0) & (out <= 1.0)))
    assert bool(jnp.all(jnp.isfinite(out)))
    print("KERNEL_OK")
</pallas_src>

<mosaic_0001>
module attributes {stable_mosaic.version = 11 : i64} {
  func.func @_conv_act_kernel(%arg0: i32, %arg1: memref<8x64xbf16, #tpu.memory_space<vmem>>, %arg2: memref<64x1024xbf16, #tpu.memory_space<vmem>>, %arg3: memref<8x1024xbf16, #tpu.memory_space<vmem>>) attributes {dimension_semantics = [#tpu.dimension_semantics<parallel>], iteration_bounds = array<i64: 2>, scalar_prefetch = 0 : i64, scratch_operands = 0 : i64, tpu.core_type = #tpu.core_type<tc>, window_params = [{pipeline_mode = #tpu.pipeline_mode<synchronous>, transform_indices = @transform_0, window_bounds = array<i64: 8, 64>}, {transform_indices = @transform_1, window_bounds = array<i64: 64, 1024>}, {transform_indices = @transform_2, window_bounds = array<i64: 8, 1024>}]} {
    %c0 = arith.constant 0 : index
    %c0_0 = arith.constant 0 : index
    %0 = vector.load %arg1[%c0, %c0_0] : memref<8x64xbf16, #tpu.memory_space<vmem>>, vector<8x64xbf16>
    %c0_1 = arith.constant 0 : index
    %c0_2 = arith.constant 0 : index
    %1 = vector.load %arg2[%c0_1, %c0_2] : memref<64x1024xbf16, #tpu.memory_space<vmem>>, vector<64x1024xbf16>
    %cst = arith.constant dense<0.000000e+00> : vector<8x1024xf32>
    %2 = tpu.matmul %0, %1, %cst {dimension_numbers = #tpu.dot_dimension_numbers<[1], [0], [0], [1], [0, 0, 1, 1], [], []>} : vector<8x64xbf16>, vector<64x1024xbf16>, vector<8x1024xf32> -> vector<8x1024xf32>
    %cst_3 = arith.constant 0.000000e+00 : f32
    %3 = vector.broadcast %cst_3 : f32 to vector<8x1024xf32>
    %4 = arith.cmpf ogt, %2, %3 : vector<8x1024xf32>
    %cst_4 = arith.constant 2.000000e-01 : f32
    %5 = vector.broadcast %cst_4 : f32 to vector<8x1024xf32>
    %6 = arith.mulf %5, %2 : vector<8x1024xf32>
    %7 = arith.select %4, %2, %6 : vector<8x1024xi1>, vector<8x1024xf32>
    %8 = arith.truncf %7 : vector<8x1024xf32> to vector<8x1024xbf16>
    %c0_5 = arith.constant 0 : index
    %c0_6 = arith.constant 0 : index
    %9 = vector.load %arg3[%c0_5, %c0_6] : memref<8x1024xbf16, #tpu.memory_space<vmem>>, vector<8x1024xbf16>
    tpu.vector_store %arg3[%c0_5, %c0_6], %8 {strides = array<i32>} : memref<8x1024xbf16, #tpu.memory_space<vmem>>, vector<8x1024xbf16>,
    return
  }
  func.func @transform_0(%arg0: i32) -> (i32, i32) {
    %c0_i32 = arith.constant 0 : i32
    %c0_i32_0 = arith.constant 0 : i32
    %c0_i32_1 = arith.constant 0 : i32
    return %c0_i32, %c0_i32_0 : i32, i32
  }
  func.func @transform_1(%arg0: i32) -> (i32, i32) {
    %c0_i32 = arith.constant 0 : i32
    %c0_i32_0 = arith.constant 0 : i32
    return %c0_i32, %arg0 : i32, i32
  }
  func.func @transform_2(%arg0: i32) -> (i32, i32) {
    %c0_i32 = arith.constant 0 : i32
    %c0_i32_0 = arith.constant 0 : i32
    return %c0_i32, %arg0 : i32, i32
  }
}

module attributes {stable_mosaic.version = 11 : i64} {
  func.func @_conv_bn_act_kernel(%arg0: memref<16x128xbf16, #tpu.memory_space<vmem>>, %arg1: memref<128x512xbf16, #tpu.memory_space<vmem>>, %arg2: memref<16x1xf32, #tpu.memory_space<vmem>>, %arg3: memref<16x1xf32, #tpu.memory_space<vmem>>, %arg4: memref<16x512xbf16, #tpu.memory_space<vmem>>) attributes {dimension_semantics = [], scalar_prefetch = 0 : i64, scratch_operands = 0 : i64, tpu.core_type = #tpu.core_type<tc>} {
    %c0 = arith.constant 0 : index
    %c0_0 = arith.constant 0 : index
    %0 = vector.load %arg0[%c0, %c0_0] : memref<16x128xbf16, #tpu.memory_space<vmem>>, vector<16x128xbf16>
    %c0_1 = arith.constant 0 : index
    %c0_2 = arith.constant 0 : index
    %1 = vector.load %arg1[%c0_1, %c0_2] : memref<128x512xbf16, #tpu.memory_space<vmem>>, vector<128x512xbf16>
    %cst = arith.constant dense<0.000000e+00> : vector<16x512xf32>
    %2 = tpu.matmul %0, %1, %cst {dimension_numbers = #tpu.dot_dimension_numbers<[1], [0], [0], [1], [0, 0, 1, 1], [], []>} : vector<16x128xbf16>, vector<128x512xbf16>, vector<16x512xf32> -> vector<16x512xf32>
    %cst_3 = arith.constant dense<0.000000e+00> : vector<16xf32>
    %3 = vector.multi_reduction <add>, %2, %cst_3 [1] : vector<16x512xf32> to vector<16xf32>
    %4 = vector.shape_cast %3 : vector<16xf32> to vector<16x1xf32>
    %cst_4 = arith.constant 5.120000e+02 : f32
    %5 = vector.broadcast %cst_4 : f32 to vector<16x1xf32>
    %6 = arith.divf %4, %5 : vector<16x1xf32>
    %7 = arith.mulf %2, %2 : vector<16x512xf32>
    %cst_5 = arith.constant dense<0.000000e+00> : vector<16xf32>
    %8 = vector.multi_reduction <add>, %7, %cst_5 [1] : vector<16x512xf32> to vector<16xf32>
    %9 = vector.shape_cast %8 : vector<16xf32> to vector<16x1xf32>
    %cst_6 = arith.constant 5.120000e+02 : f32
    %10 = vector.broadcast %cst_6 : f32 to vector<16x1xf32>
    %11 = arith.divf %9, %10 : vector<16x1xf32>
    %12 = arith.mulf %6, %6 : vector<16x1xf32>
    %13 = arith.subf %11, %12 : vector<16x1xf32>
    %cst_7 = arith.constant 0.000000e+00 : f32
    %14 = vector.broadcast %cst_7 : f32 to vector<16x1xf32>
    %15 = arith.maximumf %13, %14 : vector<16x1xf32>
    %c0_8 = arith.constant 0 : index
    %c0_9 = arith.constant 0 : index
    %16 = vector.load %arg2[%c0_8, %c0_9] : memref<16x1xf32, #tpu.memory_space<vmem>>, vector<16x1xf32>
    %cst_10 = arith.constant 9.99999974E-6 : f32
    %17 = vector.broadcast %cst_10 : f32 to vector<16x1xf32>
    %18 = arith.addf %15, %17 : vector<16x1xf32>
    %19 = math.rsqrt %18 : vector<16x1xf32>
    %20 = arith.mulf %16, %19 : vector<16x1xf32>
    %21 = vector.broadcast %6 : vector<16x1xf32> to vector<16x512xf32>
    %22 = arith.subf %2, %21 : vector<16x512xf32>
    %23 = vector.broadcast %20 : vector<16x1xf32> to vector<16x512xf32>
    %24 = arith.mulf %22, %23 : vector<16x512xf32>
    %c0_11 = arith.constant 0 : index
    %c0_12 = arith.constant 0 : index
    %25 = vector.load %arg3[%c0_11, %c0_12] : memref<16x1xf32, #tpu.memory_space<vmem>>, vector<16x1xf32>
    %26 = vector.broadcast %25 : vector<16x1xf32> to vector<16x512xf32>
    %27 = arith.addf %24, %26 : vector<16x512xf32>
    %cst_13 = arith.constant 0.000000e+00 : f32
    %28 = vector.broadcast %cst_13 : f32 to vector<16x512xf32>
    %29 = arith.cmpf ogt, %27, %28 : vector<16x512xf32>
    %cst_14 = arith.constant 2.000000e-01 : f32
    %30 = vector.broadcast %cst_14 : f32 to vector<16x512xf32>
    %31 = arith.mulf %30, %27 : vector<16x512xf32>
    %32 = arith.select %29, %27, %31 : vector<16x512xi1>, vector<16x512xf32>
    %33 = arith.truncf %32 : vector<16x512xf32> to vector<16x512xbf16>
    %c0_15 = arith.constant 0 : index
    %c0_16 = arith.constant 0 : index
    %34 = vector.load %arg4[%c0_15, %c0_16] : memref<16x512xbf16, #tpu.memory_space<vmem>>, vector<16x512xbf16>
    tpu.vector_store %arg4[%c0_15, %c0_16], %33 {strides = array<i32>} : memref<16x512xbf16, #tpu.memory_space<vmem>>, vector<16x512xbf16>,
    return
  }
}

module attributes {stable_mosaic.version = 11 : i64} {
  func.func @_conv_bn_act_kernel(%arg0: memref<32x256xbf16, #tpu.memory_space<vmem>>, %arg1: memref<256x128xbf16, #tpu.memory_space<vmem>>, %arg2: memref<32x1xf32, #tpu.memory_space<vmem>>, %arg3: memref<32x1xf32, #tpu.memory_space<vmem>>, %arg4: memref<32x128xbf16, #tpu.memory_space<vmem>>) attributes {dimension_semantics = [], scalar_prefetch = 0 : i64, scratch_operands = 0 : i64, tpu.core_type = #tpu.core_type<tc>} {
    %c0 = arith.constant 0 : index
    %c0_0 = arith.constant 0 : index
    %0 = vector.load %arg0[%c0, %c0_0] : memref<32x256xbf16, #tpu.memory_space<vmem>>, vector<32x256xbf16>
    %c0_1 = arith.constant 0 : index
    %c0_2 = arith.constant 0 : index
    %1 = vector.load %arg1[%c0_1, %c0_2] : memref<256x128xbf16, #tpu.memory_space<vmem>>, vector<256x128xbf16>
    %cst = arith.constant dense<0.000000e+00> : vector<32x128xf32>
    %2 = tpu.matmul %0, %1, %cst {dimension_numbers = #tpu.dot_dimension_numbers<[1], [0], [0], [1], [0, 0, 1, 1], [], []>} : vector<32x256xbf16>, vector<256x128xbf16>, vector<32x128xf32> -> vector<32x128xf32>
    %cst_3 = arith.constant dense<0.000000e+00> : vector<32xf32>
    %3 = vector.multi_reduction <add>, %2, %cst_3 [1] : vector<32x128xf32> to vector<32xf32>
    %4 = vector.shape_cast %3 : vector<32xf32> to vector<32x1xf32>
    %cst_4 = arith.constant 1.280000e+02 : f32
    %5 = vector.broadcast %cst_4 : f32 to vector<32x1xf32>
    %6 = arith.divf %4, %5 : vector<32x1xf32>
    %7 = arith.mulf %2, %2 : vector<32x128xf32>
    %cst_5 = arith.constant dense<0.000000e+00> : vector<32xf32>
    %8 = vector.multi_reduction <add>, %7, %cst_5 [1] : vector<32x128xf32> to vector<32xf32>
    %9 = vector.shape_cast %8 : vector<32xf32> to vector<32x1xf32>
    %cst_6 = arith.constant 1.280000e+02 : f32
    %10 = vector.broadcast %cst_6 : f32 to vector<32x1xf32>
    %11 = arith.divf %9, %10 : vector<32x1xf32>
    %12 = arith.mulf %6, %6 : vector<32x1xf32>
    %13 = arith.subf %11, %12 : vector<32x1xf32>
    %cst_7 = arith.constant 0.000000e+00 : f32
    %14 = vector.broadcast %cst_7 : f32 to vector<32x1xf32>
    %15 = arith.maximumf %13, %14 : vector<32x1xf32>
    %c0_8 = arith.constant 0 : index
    %c0_9 = arith.constant 0 : index
    %16 = vector.load %arg2[%c0_8, %c0_9] : memref<32x1xf32, #tpu.memory_space<vmem>>, vector<32x1xf32>
    %cst_10 = arith.constant 9.99999974E-6 : f32
    %17 = vector.broadcast %cst_10 : f32 to vector<32x1xf32>
    %18 = arith.addf %15, %17 : vector<32x1xf32>
    %19 = math.rsqrt %18 : vector<32x1xf32>
    %20 = arith.mulf %16, %19 : vector<32x1xf32>
    %21 = vector.broadcast %6 : vector<32x1xf32> to vector<32x128xf32>
    %22 = arith.subf %2, %21 : vector<32x128xf32>
    %23 = vector.broadcast %20 : vector<32x1xf32> to vector<32x128xf32>
    %24 = arith.mulf %22, %23 : vector<32x128xf32>
    %c0_11 = arith.constant 0 : index
    %c0_12 = arith.constant 0 : index
    %25 = vector.load %arg3[%c0_11, %c0_12] : memref<32x1xf32, #tpu.memory_space<vmem>>, vector<32x1xf32>
    %26 = vector.broadcast %25 : vector<32x1xf32> to vector<32x128xf32>
    %27 = arith.addf %24, %26 : vector<32x128xf32>
    %cst_13 = arith.constant 0.000000e+00 : f32
    %28 = vector.broadcast %cst_13 : f32 to vector<32x128xf32>
    %29 = arith.cmpf ogt, %27, %28 : vector<32x128xf32>
    %cst_14 = arith.constant 2.000000e-01 : f32
    %30 = vector.broadcast %cst_14 : f32 to vector<32x128xf32>
    %31 = arith.mulf %30, %27 : vector<32x128xf32>
    %32 = arith.select %29, %27, %31 : vector<32x128xi1>, vector<32x128xf32>
    %33 = arith.truncf %32 : vector<32x128xf32> to vector<32x128xbf16>
    %c0_15 = arith.constant 0 : index
    %c0_16 = arith.constant 0 : index
    %34 = vector.load %arg4[%c0_15, %c0_16] : memref<32x128xbf16, #tpu.memory_space<vmem>>, vector<32x128xbf16>
    tpu.vector_store %arg4[%c0_15, %c0_16], %33 {strides = array<i32>} : memref<32x128xbf16, #tpu.memory_space<vmem>>, vector<32x128xbf16>,
    return
  }
}

module attributes {stable_mosaic.version = 11 : i64} {
  func.func @_tail_kernel(%arg0: memref<64x512xbf16, #tpu.memory_space<vmem>>, %arg1: memref<512x32xbf16, #tpu.memory_space<vmem>>, %arg2: memref<64x1xf32, #tpu.memory_space<vmem>>, %arg3: memref<64x1xf32, #tpu.memory_space<vmem>>, %arg4: memref<64x32xf32, #tpu.memory_space<vmem>>, %arg5: memref<32x2xf32, #tpu.memory_space<vmem>>, %arg6: memref<1x2xf32, #tpu.memory_space<vmem>>) attributes {dimension_semantics = [], scalar_prefetch = 0 : i64, scratch_operands = 0 : i64, tpu.core_type = #tpu.core_type<tc>} {
    %c0 = arith.constant 0 : index
    %c0_0 = arith.constant 0 : index
    %0 = vector.load %arg0[%c0, %c0_0] : memref<64x512xbf16, #tpu.memory_space<vmem>>, vector<64x512xbf16>
    %c0_1 = arith.constant 0 : index
    %c0_2 = arith.constant 0 : index
    %1 = vector.load %arg1[%c0_1, %c0_2] : memref<512x32xbf16, #tpu.memory_space<vmem>>, vector<512x32xbf16>
    %cst = arith.constant dense<0.000000e+00> : vector<64x32xf32>
    %2 = tpu.matmul %0, %1, %cst {dimension_numbers = #tpu.dot_dimension_numbers<[1], [0], [0], [1], [0, 0, 1, 1], [], []>} : vector<64x512xbf16>, vector<512x32xbf16>, vector<64x32xf32> -> vector<64x32xf32>
    %cst_3 = arith.constant dense<0.000000e+00> : vector<64xf32>
    %3 = vector.multi_reduction <add>, %2, %cst_3 [1] : vector<64x32xf32> to vector<64xf32>
    %4 = vector.shape_cast %3 : vector<64xf32> to vector<64x1xf32>
    %cst_4 = arith.constant 3.200000e+01 : f32
    %5 = vector.broadcast %cst_4 : f32 to vector<64x1xf32>
    %6 = arith.divf %4, %5 : vector<64x1xf32>
    %7 = arith.mulf %2, %2 : vector<64x32xf32>
    %cst_5 = arith.constant dense<0.000000e+00> : vector<64xf32>
    %8 = vector.multi_reduction <add>, %7, %cst_5 [1] : vector<64x32xf32> to vector<64xf32>
    %9 = vector.shape_cast %8 : vector<64xf32> to vector<64x1xf32>
    %cst_6 = arith.constant 3.200000e+01 : f32
    %10 = vector.broadcast %cst_6 : f32 to vector<64x1xf32>
    %11 = arith.divf %9, %10 : vector<64x1xf32>
    %12 = arith.mulf %6, %6 : vector<64x1xf32>
    %13 = arith.subf %11, %12 : vector<64x1xf32>
    %cst_7 = arith.constant 0.000000e+00 : f32
    %14 = vector.broadcast %cst_7 : f32 to vector<64x1xf32>
    %15 = arith.maximumf %13, %14 : vector<64x1xf32>
    %c0_8 = arith.constant 0 : index
    %c0_9 = arith.constant 0 : index
    %16 = vector.load %arg2[%c0_8, %c0_9] : memref<64x1xf32, #tpu.memory_space<vmem>>, vector<64x1xf32>
    %cst_10 = arith.constant 9.99999974E-6 : f32
    %17 = vector.broadcast %cst_10 : f32 to vector<64x1xf32>
    %18 = arith.addf %15, %17 : vector<64x1xf32>
    %19 = math.rsqrt %18 : vector<64x1xf32>
    %20 = arith.mulf %16, %19 : vector<64x1xf32>
    %21 = vector.broadcast %6 : vector<64x1xf32> to vector<64x32xf32>
    %22 = arith.subf %2, %21 : vector<64x32xf32>
    %23 = vector.broadcast %20 : vector<64x1xf32> to vector<64x32xf32>
    %24 = arith.mulf %22, %23 : vector<64x32xf32>
    %c0_11 = arith.constant 0 : index
    %c0_12 = arith.constant 0 : index
    %25 = vector.load %arg3[%c0_11, %c0_12] : memref<64x1xf32, #tpu.memory_space<vmem>>, vector<64x1xf32>
    %26 = vector.broadcast %25 : vector<64x1xf32> to vector<64x32xf32>
    %27 = arith.addf %24, %26 : vector<64x32xf32>
    %cst_13 = arith.constant 0.000000e+00 : f32
    %28 = vector.broadcast %cst_13 : f32 to vector<64x32xf32>
    %29 = arith.cmpf ogt, %27, %28 : vector<64x32xf32>
    %cst_14 = arith.constant 2.000000e-01 : f32
    %30 = vector.broadcast %cst_14 : f32 to vector<64x32xf32>
    %31 = arith.mulf %30, %27 : vector<64x32xf32>
    %32 = arith.select %29, %27, %31 : vector<64x32xi1>, vector<64x32xf32>
    %c0_15 = arith.constant 0 : index
    %c0_16 = arith.constant 0 : index
    %33 = vector.load %arg4[%c0_15, %c0_16] : memref<64x32xf32, #tpu.memory_space<vmem>>, vector<64x32xf32>
    %34 = arith.mulf %32, %33 : vector<64x32xf32>
    %cst_17 = arith.constant dense<0.000000e+00> : vector<32xf32>
    %35 = vector.multi_reduction <add>, %34, %cst_17 [0] : vector<64x32xf32> to vector<32xf32>
    %36 = vector.shape_cast %35 : vector<32xf32> to vector<1x32xf32>
    %c0_18 = arith.constant 0 : index
    %c0_19 = arith.constant 0 : index
    %37 = vector.load %arg5[%c0_18, %c0_19] : memref<32x2xf32, #tpu.memory_space<vmem>>, vector<32x2xf32>
    %cst_20 = arith.constant dense<0.000000e+00> : vector<1x2xf32>
    %38 = tpu.matmul %36, %37, %cst_20 {dimension_numbers = #tpu.dot_dimension_numbers<[1], [0], [0], [1], [0, 0, 1, 1], [], []>} : vector<1x32xf32>, vector<32x2xf32>, vector<1x2xf32> -> vector<1x2xf32>
    %cst_21 = arith.constant 0.000000e+00 : f32
    %39 = vector.broadcast %cst_21 : f32 to vector<1x2xf32>
    %40 = arith.subf %39, %38 : vector<1x2xf32>
    %41 = math.exp %40 : vector<1x2xf32>
    %cst_22 = arith.constant 1.000000e+00 : f32
    %42 = vector.broadcast %cst_22 : f32 to vector<1x2xf32>
    %43 = arith.addf %42, %41 : vector<1x2xf32>
    %cst_23 = arith.constant 1.000000e+00 : f32
    %44 = vector.broadcast %cst_23 : f32 to vector<1x2xf32>
    %45 = arith.divf %44, %43 : vector<1x2xf32>
    %c0_24 = arith.constant 0 : index
    %c0_25 = arith.constant 0 : index
    %46 = vector.load %arg6[%c0_24, %c0_25] : memref<1x2xf32, #tpu.memory_space<vmem>>, vector<1x2xf32>
    tpu.vector_store %arg6[%c0_24, %c0_25], %45 {strides = array<i32>} : memref<1x2xf32, #tpu.memory_space<vmem>>, vector<1x2xf32>,
    return
  }
}

</mosaic_0001>

<bundles_post_ra>
// kernel: discriminator_forward.4
= control target key start
LH: loop header
LB: loop body
LE: loop exit
PB: predicated region body
PF: predicated region fallthrough
CT: control target
= control target key end

     0   :  { %s835_s9 = smov 0   ;;  %s837_s10 = smov 0   ;;  %s1006_s0 = inlined_call_operand.vmem [shape: bf16[8,64], index: 0, kind: input, shape index: {}]   ;;  %s1007_s1 = inlined_call_operand.vmem [shape: bf16[64,2048], index: 1, kind: input, shape index: {}]   ;;  %s1008_s2 = inlined_call_operand.vmem [shape: bf16[8,2048], index: 2, kind: output, shape index: {}]  }
   0x1   :  { %s839_s11 = smov 0  }
   0x2 LB: > { %s712_s12 = sadd.s32 4294967295, %s817_s11   ;;  %s852_s13 = sadd.s32 1, %s817_s11   ;;  %s817_s11 = sphi %s839_s11, %s1011_s11   ;;  %s813_s10 = sphi %s837_s10, %s1010_s10   ;;  %s809_s9 = sphi %s835_s9, %s1009_s9  }
   0x3   : > { %s37_s14 = ssub.s32 %s817_s11, %s852_s13  ;;  %s40_s15 = sadd.s32 1, %s813_s10 }
   0x4   : > { %p38_p0 = scmp.eq.s32.totalorder %s37_s14, 0  ;;  %p47_p1 = scmp.ne.s32.totalorder %s813_s10, %s809_s9 }
   0x5   : > { %p48_p2 = scmp.eq.s32.totalorder %s817_s11, 0  ;;  %p715_p4 = scmp.ge.s32.totalorder %s817_s11, 2 }
   0x6   : > { %s861_s16 = scalar_select %p38_p0, %s813_s10, %s40_s15  }
   0x7   : > { %p49_p3 = por %p48_p2, %p47_p1  ;;  %102 = sbr.rel (%p715_p4) target bundleno = 34 (0x22), region = 20 }
   0xe   : > { %105 = sbr.rel (!%p49_p3) target bundleno = 34 (0x22), region = 24  ;;  %s107_s17 = sand.u32 (%p49_p3), 1, %s813_s10  }
   0xf   : > { %s765_s18 = sshll.u32 (%p49_p3), %s817_s11, 5  ;;  %s716_s19 = sshll.u32 (%p49_p3), %s107_s17, 8 }
  0x10   : > { %s869_s22 = scalar_lea.vmem (%p49_p3), %s1007_s1, %s765_s18  ;;  %s874_s23 = scalar_lea.vmem (%p49_p3), [#allocation2], %s716_s19 }
  0x11   : > { %v125_v0 = vld [vmem:[%s869_s22] sm:$0xff] (%p49_p3)  ;;  %v127_v1 = vld [vmem:[%s869_s22 + $0x8] sm:$0xff] (%p49_p3)  ;;  %v129_v2 = vld [vmem:[%s869_s22 + $0x10] sm:$0xff] (%p49_p3) }
  0x12   : > { %126 = vst [vmem:[%s874_s23] sm:$0xff] (%p49_p3), %v125_v0  ;;  %128 = vst [vmem:[%s874_s23 + $0x8] sm:$0xff] (%p49_p3), %v127_v1  ;;  %v131_v3 = vld [vmem:[%s869_s22 + $0x18] sm:$0xff] (%p49_p3)  ;;  %v133_v4 = vld [vmem:[%s869_s22 + $0x40] sm:$0xff] (%p49_p3) }
  0x13   : > { %130 = vst [vmem:[%s874_s23 + $0x10] sm:$0xff] (%p49_p3), %v129_v2  ;;  %v135_v5 = vld [vmem:[%s869_s22 + $0x48] sm:$0xff] (%p49_p3)  ;;  %132 = vst [vmem:[%s874_s23 + $0x18] sm:$0xff] (%p49_p3), %v131_v3  ;;  %v137_v6 = vld [vmem:[%s869_s22 + $0x50] sm:$0xff] (%p49_p3) }
  0x14   : > { %134 = vst [vmem:[%s874_s23 + $0x20] sm:$0xff] (%p49_p3), %v133_v4  ;;  %136 = vst [vmem:[%s874_s23 + $0x28] sm:$0xff] (%p49_p3), %v135_v5  ;;  %v139_v7 = vld [vmem:[%s869_s22 + $0x58] sm:$0xff] (%p49_p3)  ;;  %v141_v8 = vld [vmem:[%s869_s22 + $0x80] sm:$0xff] (%p49_p3) }
  0x15   : > { %138 = vst [vmem:[%s874_s23 + $0x30] sm:$0xff] %v137_v6  ;;  %140 = vst [vmem:[%s874_s23 + $0x38] sm:$0xff] %v139_v7  ;;  %v143_v9 = vld [vmem:[%s869_s22 + $0x88] sm:$0xff]  ;;  %v145_v10 = vld [vmem:[%s869_s22 + $0x90] sm:$0xff] }
  0x16   : > { %142 = vst [vmem:[%s874_s23 + $0x40] sm:$0xff] %v141_v8  ;;  %v147_v11 = vld [vmem:[%s869_s22 + $0x98] sm:$0xff]  ;;  %144 = vst [vmem:[%s874_s23 + $0x48] sm:$0xff] %v143_v9  ;;  %v149_v12 = vld [vmem:[%s869_s22 + $0xc0] sm:$0xff] }
  0x17   : > { %146 = vst [vmem:[%s874_s23 + $0x50] sm:$0xff] %v145_v10  ;;  %148 = vst [vmem:[%s874_s23 + $0x58] sm:$0xff] %v147_v11  ;;  %v151_v13 = vld [vmem:[%s869_s22 + $0xc8] sm:$0xff]  ;;  %v153_v14 = vld [vmem:[%s869_s22 + $0xd0] sm:$0xff] }
  0x18   : > { %150 = vst [vmem:[%s874_s23 + $0x60] sm:$0xff] %v149_v12  ;;  %152 = vst [vmem:[%s874_s23 + $0x68] sm:$0xff] %v151_v13  ;;  %v155_v15 = vld [vmem:[%s869_s22 + $0xd8] sm:$0xff]  ;;  %v157_v16 = vld [vmem:[%s869_s22 + $0x100] sm:$0xff] }
  0x19   : > { %154 = vst [vmem:[%s874_s23 + $0x70] sm:$0xff] %v153_v14  ;;  %v159_v17 = vld [vmem:[%s869_s22 + $0x108] sm:$0xff]  ;;  %156 = vst [vmem:[%s874_s23 + $0x78] sm:$0xff] %v155_v15  ;;  %v161_v18 = vld [vmem:[%s869_s22 + $0x110] sm:$0xff] }
  0x1a   : > { %158 = vst [vmem:[%s874_s23 + $0x80] sm:$0xff] %v157_v16  ;;  %160 = vst [vmem:[%s874_s23 + $0x88] sm:$0xff] %v159_v17  ;;  %v163_v19 = vld [vmem:[%s869_s22 + $0x118] sm:$0xff]  ;;  %v165_v20 = vld [vmem:[%s869_s22 + $0x140] sm:$0xff] }
  0x1b   : > { %162 = vst [vmem:[%s874_s23 + $0x90] sm:$0xff] %v161_v18  ;;  %164 = vst [vmem:[%s874_s23 + $0x98] sm:$0xff] %v163_v19  ;;  %v167_v21 = vld [vmem:[%s869_s22 + $0x148] sm:$0xff]  ;;  %v169_v22 = vld [vmem:[%s869_s22 + $0x150] sm:$0xff] }
  0x1c   : > { %166 = vst [vmem:[%s874_s23 + $0xa0] sm:$0xff] %v165_v20  ;;  %v171_v23 = vld [vmem:[%s869_s22 + $0x158] sm:$0xff]  ;;  %168 = vst [vmem:[%s874_s23 + $0xa8] sm:$0xff] %v167_v21  ;;  %v173_v24 = vld [vmem:[%s869_s22 + $0x180] sm:$0xff] }
  0x1d   : > { %170 = vst [vmem:[%s874_s23 + $0xb0] sm:$0xff] %v169_v22  ;;  %172 = vst [vmem:[%s874_s23 + $0xb8] sm:$0xff] %v171_v23  ;;  %v175_v25 = vld [vmem:[%s869_s22 + $0x188] sm:$0xff]  ;;  %v177_v26 = vld [vmem:[%s869_s22 + $0x190] sm:$0xff] }
  0x1e   : > { %174 = vst [vmem:[%s874_s23 + $0xc0] sm:$0xff] %v173_v24  ;;  %176 = vst [vmem:[%s874_s23 + $0xc8] sm:$0xff] %v175_v25  ;;  %v179_v27 = vld [vmem:[%s869_s22 + $0x198] sm:$0xff]  ;;  %v181_v28 = vld [vmem:[%s869_s22 + $0x1c0] sm:$0xff] }
  0x1f   : > { %178 = vst [vmem:[%s874_s23 + $0xd0] sm:$0xff] %v177_v26  ;;  %v183_v29 = vld [vmem:[%s869_s22 + $0x1c8] sm:$0xff]  ;;  %180 = vst [vmem:[%s874_s23 + $0xd8] sm:$0xff] %v179_v27  ;;  %v185_v30 = vld [vmem:[%s869_s22 + $0x1d0] sm:$0xff] }
  0x20   : > { %182 = vst [vmem:[%s874_s23 + $0xe0] sm:$0xff] %v181_v28  ;;  %184 = vst [vmem:[%s874_s23 + $0xe8] sm:$0xff] %v183_v29  ;;  %v187_v31 = vld [vmem:[%s869_s22 + $0x1d8] sm:$0xff] }
  0x21   : > { %186 = vst [vmem:[%s874_s23 + $0xf0] sm:$0xff] %v185_v30  ;;  %188 = vst [vmem:[%s874_s23 + $0xf8] sm:$0xff] %v187_v31 }
  0x22 PF: > { %p719_p5 = scmp.ge.s32.totalorder %s817_s11, 1  ;;  %p193_p6 = scmp.lt.s32.totalorder %s817_s11, 3 }
  0x24   : > { %p194_p7 = pnand %p719_p5, %p193_p6 }
  0x25   : > { %s200_s24 = sand.u32 (!%p194_p7), 1, %s809_s9   ;;  %v819_v32 = vmov (!%p194_p7), 0   ;;  %v229_v11 = vld [vmem:[%s1006_s0] sm:$0xf] (!%p194_p7)  ;;  %vm422_vm0 = vcmask (!%p194_p7), 523264   ;;  %s721_s29 = sshll.u32 (!%p194_p7), %s712_s12, 3 }
  0x26   : > { %197 = sbr.rel (%p194_p7) target bundleno = 296 (0x128), region = 47  ;;  %s720_s25 = sshll.u32 (!%p194_p7), %s200_s24, 8  ;;  %458 = vmatprep.mubr.bf16.mxu0 (!%p194_p7), %v819_v32  ;;  %499 = vmatprep.mubr.bf16.mxu1 (!%p194_p7), %v819_v32 }
  0x27   : > { %s942_s26 = scalar_lea.vmem (!%p194_p7), [#allocation2], %s720_s25  ;;  %p223_p8 = scmp.lt.s32.totalorder (!%p194_p7), %s721_s29, 15 }
  0x28   : > { %v230_v33 = vld [vmem:[%s942_s26] sm:$0xff] (!%p194_p7)  ;;  %v231_v35 = vld [vmem:[%s942_s26 + $0x8] sm:$0xff] (!%p194_p7)  ;;  %v232_v63 = vld [vmem:[%s942_s26 + $0x10] sm:$0xff] (!%p194_p7) }
  0x29   : > { %v234_v34 = vld [vmem:[%s942_s26 + $0x20] sm:$0xff] (!%p194_p7)  ;;  %v235_v37 = vld [vmem:[%s942_s26 + $0x28] sm:$0xff] (!%p194_p7)  ;;  %v236_v0 = vld [vmem:[%s942_s26 + $0x30] sm:$0xff] (!%p194_p7) }
  0x2a   : > { %v724_v36 = vcombine.high (!%p194_p7), %v230_v33, %v234_v34  ;;  %v723_v38 = vcombine.low (!%p194_p7), %v230_v33, %v234_v34  ;;  %v238_v39 = vld [vmem:[%s942_s26 + $0x40] sm:$0xff] (!%p194_p7)  ;;  %v726_v41 = vcombine.high (!%p194_p7), %v231_v35, %v235_v37  ;;  %v725_v42 = vcombine.low (!%p194_p7), %v231_v35, %v235_v37  ;;  %v239_v44 = vld [vmem:[%s942_s26 + $0x48] sm:$0xff] (!%p194_p7)  ;;  %v233_v1 = vld [vmem:[%s942_s26 + $0x18] sm:$0xff] (!%p194_p7) }
  0x2b   : > { %v242_v40 = vld [vmem:[%s942_s26 + $0x60] sm:$0xff] (!%p194_p7)  ;;  %v243_v45 = vld [vmem:[%s942_s26 + $0x68] sm:$0xff] (!%p194_p7)  ;;  %v237_v2 = vld [vmem:[%s942_s26 + $0x38] sm:$0xff] (!%p194_p7)  ;;  %v728_v5 = vcombine.high (!%p194_p7), %v232_v63, %v236_v0  ;;  %v727_v12 = vcombine.low (!%p194_p7), %v232_v63, %v236_v0 }
  0x2c   : > { %v732_v43 = vcombine.high (!%p194_p7), %v238_v39, %v242_v40  ;;  %v246_v46 = vld [vmem:[%s942_s26 + $0x80] sm:$0xff] (!%p194_p7)  ;;  %426 = vmatprep.subr.bf16.mxu0 (!%p194_p7), %v724_v36  ;;  %v734_v47 = vcombine.high (!%p194_p7), %v239_v44, %v243_v45  ;;  %v247_v49 = vld [vmem:[%s942_s26 + $0x88] sm:$0xff] (!%p194_p7)  ;;  %467 = vmatprep.subr.bf16.mxu1 (!%p194_p7), %v726_v41  ;;  %v731_v51 = vcombine.low (!%p194_p7), %v238_v39, %v242_v40  ;;  %v240_v7 = vld [vmem:[%s942_s26 + $0x50] sm:$0xff] (!%p194_p7) }
  0x2d   : > { %v250_v48 = vld [vmem:[%s942_s26 + $0xa0] sm:$0xff]  ;;  %v251_v50 = vld [vmem:[%s942_s26 + $0xa8] sm:$0xff]  ;;  %427 = vmatpush1.bf16.msra.mxu0 %v723_v38  ;;  %468 = vmatpush1.bf16.msra.mxu1 %v725_v42  ;;  %v733_v52 = vcombine.low %v239_v44, %v243_v45  ;;  %v730_v6 = vcombine.high %v233_v1, %v237_v2  ;;  %v244_v8 = vld [vmem:[%s942_s26 + $0x70] sm:$0xff]  ;;  %v729_v13 = vcombine.low %v233_v1, %v237_v2  ;;  %s1013_s29 = smov (!%p223_p8, %s721_s29), 15 }
  0x2e   : > { %428 = vmatprep.subr.bf16.mxu0 %v732_v43  ;;  %v740_v53 = vcombine.high %v246_v46, %v250_v48  ;;  %469 = vmatprep.subr.bf16.mxu1 %v734_v47  ;;  %v742_v54 = vcombine.high %v247_v49, %v251_v50  ;;  %v254_v55 = vld [vmem:[%s942_s26 + $0xc0] sm:$0xff]  ;;  %v255_v57 = vld [vmem:[%s942_s26 + $0xc8] sm:$0xff]  ;;  %v739_v59 = vcombine.low %v246_v46, %v250_v48  ;;  %v241_v9 = vld [vmem:[%s942_s26 + $0x58] sm:$0xff]  ;;  %s722_s30 = sshll.u32 %s1013_s29, 2 }
  0x2f   : > { %v258_v56 = vld [vmem:[%s942_s26 + $0xe0] sm:$0xff]  ;;  %v259_v58 = vld [vmem:[%s942_s26 + $0xe8] sm:$0xff]  ;;  %v741_v60 = vcombine.low %v247_v49, %v251_v50  ;;  %v245_v10 = vld [vmem:[%s942_s26 + $0x78] sm:$0xff]  ;;  %v736_v14 = vcombine.high %v240_v7, %v244_v8  ;;  %v735_v20 = vcombine.low %v240_v7, %v244_v8  ;;  %s990_s5 = scalar_lea.vmem %s1008_s2, %s722_s30 }
  0x30   : > { %v748_v61 = vcombine.high %v254_v55, %v258_v56  ;;  %v750_v62 = vcombine.high %v255_v57, %v259_v58  ;;  %v747_v3 = vcombine.low %v254_v55, %v258_v56  ;;  %v749_v4 = vcombine.low %v255_v57, %v259_v58  ;;  %v248_v16 = vld [vmem:[%s942_s26 + $0x90] sm:$0xff]  ;;  %v249_v18 = vld [vmem:[%s942_s26 + $0x98] sm:$0xff] }
  0x31   : > { %429 = vmatpush1.bf16.msra.mxu0 %v731_v51  ;;  %470 = vmatpush1.bf16.msra.mxu1 %v733_v52  ;;  %v738_v15 = vcombine.high %v241_v9, %v245_v10  ;;  %v252_v17 = vld [vmem:[%s942_s26 + $0xb0] sm:$0xff]  ;;  %v253_v19 = vld [vmem:[%s942_s26 + $0xb8] sm:$0xff]  ;;  %v737_v21 = vcombine.low %v241_v9, %v245_v10 }
  0x32   : > { %430 = vmatprep.subr.bf16.mxu0 %v740_v53  ;;  %471 = vmatprep.subr.bf16.mxu1 %v742_v54  ;;  %v744_v22 = vcombine.high %v248_v16, %v252_v17  ;;  %v746_v23 = vcombine.high %v249_v18, %v253_v19  ;;  %v256_v24 = vld [vmem:[%s942_s26 + $0xd0] sm:$0xff]  ;;  %v257_v26 = vld [vmem:[%s942_s26 + $0xd8] sm:$0xff]  ;;  %v743_v28 = vcombine.low %v248_v16, %v252_v17 }
  0x33   : > { %v260_v25 = vld [vmem:[%s942_s26 + $0xf0] sm:$0xff]  ;;  %v261_v27 = vld [vmem:[%s942_s26 + $0xf8] sm:$0xff]  ;;  %v745_v29 = vcombine.low %v249_v18, %v253_v19 }
  0x34   : > { %v752_v30 = vcombine.high %v256_v24, %v260_v25  ;;  %v754_v31 = vcombine.high %v257_v26, %v261_v27  ;;  %v751_v33 = vcombine.low %v256_v24, %v260_v25  ;;  %v753_v34 = vcombine.low %v257_v26, %v261_v27 }
  0x35   : > { %431 = vmatpush1.bf16.msra.mxu0 %v739_v59  ;;  %472 = vmatpush1.bf16.msra.mxu1 %v741_v60 }
  0x36   : > { %432 = vmatprep.subr.bf16.mxu0 %v748_v61  ;;  %473 = vmatprep.subr.bf16.mxu1 %v750_v62 }
  0x39   : > { %433 = vmatpush1.bf16.msra.mxu0 %v747_v3  ;;  %474 = vmatpush1.bf16.msra.mxu1 %v749_v4 }
  0x3a   : > { %508 = vmatprep.subr.bf16.mxu0 %v728_v5  ;;  %549 = vmatprep.subr.bf16.mxu1 %v730_v6 }
  0x3c   : > { %755 = vmatmul.mubr.msk.bf16.vlgmr.msra.gmra.mrb[0].mxu0 %vm422_vm0, %v229_v11  ;;  %756 = vmatmul.mubr.msk.bf16.vlgmr.msra.gmra.mrb[0].mxu1 %vm422_vm0, %v229_v11 }
  0x3d   : > { %509 = vmatpush1.bf16.msra.mxu0 %v727_v12  ;;  %550 = vmatpush1.bf16.msra.mxu1 %v729_v13 }
  0x3e   : > { %510 = vmatprep.subr.bf16.mxu0 %v736_v14  ;;  %551 = vmatprep.subr.bf16.mxu1 %v738_v15 }
  0x3f   : > { %540 = vmatprep.mubr.bf16.mxu0 %v819_v32  ;;  %581 = vmatprep.mubr.bf16.mxu1 %v819_v32 }
  0x41   : > { %511 = vmatpush1.bf16.msra.mxu0 %v735_v20  ;;  %552 = vmatpush1.bf16.msra.mxu1 %v737_v21 }
  0x42   : > { %512 = vmatprep.subr.bf16.mxu0 %v744_v22  ;;  %553 = vmatprep.subr.bf16.mxu1 %v746_v23 }
  0x45   : > { %513 = vmatpush1.bf16.msra.mxu0 %v743_v28  ;;  %554 = vmatpush1.bf16.msra.mxu1 %v745_v29 }
  0x46   : > { %514 = vmatprep.subr.bf16.mxu0 %v752_v30  ;;  %555 = vmatprep.subr.bf16.mxu1 %v754_v31 }
  0x49   : > { %515 = vmatpush1.bf16.msra.mxu0 %v751_v33  ;;  %556 = vmatpush1.bf16.msra.mxu1 %v753_v34 }
  0x4c   : > { %757 = vmatmul.mubr.msk.bf16.vlgmr.msra.gmra.mrb[4].mxu0 %vm422_vm0, %v229_v11  ;;  %758 = vmatmul.mubr.msk.bf16.vlgmr.msra.gmra.mrb[4].mxu1 %vm422_vm0, %v229_v11 }
 0x10f   : > { %v460_v32 = vpop.f32.mrb[0].mxu0  ;;  %v501_v36 = vpop.f32.mrb[0].mxu1 }
 0x110   : > { %vm590_vm1 = vcmp.gt.f32.partialorder %v460_v32, 0.0  ;;  %v598_v35 = vmul.f32 0.2, %v460_v32  ;;  %v462_v37 = vpop.f32.mrb[1].mxu0  ;;  %vm592_vm2 = vcmp.gt.f32.partialorder %v501_v36, 0.0  ;;  %v503_v41 = vpop.f32.mrb[1].mxu1 }
 0x111   : > { %v600_v38 = vmul.f32 0.2, %v501_v36  ;;  %vm591_vm3 = vcmp.gt.f32.partialorder %v462_v37, 0.0  ;;  %v599_v39 = vmul.f32 0.2, %v462_v37  ;;  %v464_v42 = vpop.f32.mrb[2].mxu0 }
 0x112   : > { %v606_v40 = vsel %vm590_vm1, %v460_v32, %v598_v35  ;;  %vm593_vm4 = vcmp.gt.f32.partialorder %v503_v41, 0.0  ;;  %v601_v45 = vmul.f32 0.2, %v503_v41  ;;  %v505_v46 = vpop.f32.mrb[2].mxu1  ;;  %v465_v47 = vpop.f32.mrb[3].mxu0 }
 0x113   : > { %v608_v43 = vsel %vm592_vm2, %v501_v36, %v600_v38  ;;  %v607_v44 = vsel %vm591_vm3, %v462_v37, %v599_v39  ;;  %v506_v49 = vpop.f32.mrb[3].mxu1 }
 0x114   : > { %v766_v48 = vpack.c.bf16 %v607_v44, %v606_v40  ;;  %v609_v50 = vsel %vm593_vm4, %v503_v41, %v601_v45 }
 0x115   : > { %v767_v51 = vpack.c.bf16 %v609_v50, %v608_v43 }
 0x116   : > { %646 = vst [vmem:[%s990_s5] sm:$0xff] %v766_v48 }
 0x117   : > { %647 = vst [vmem:[%s990_s5 + $0x8] sm:$0xff] %v767_v51 }
 0x11f   : > { %v542_v52 = vpop.f32.mrb[4].mxu0  ;;  %v583_v54 = vpop.f32.mrb[4].mxu1 }
 0x120   : > { %vm594_vm5 = vcmp.gt.f32.partialorder %v542_v52, 0.0  ;;  %v602_v53 = vmul.f32 0.2, %v542_v52  ;;  %v544_v55 = vpop.f32.mrb[5].mxu0  ;;  %vm596_vm6 = vcmp.gt.f32.partialorder %v583_v54, 0.0  ;;  %v585_v59 = vpop.f32.mrb[5].mxu1 }
 0x121   : > { %v604_v56 = vmul.f32 0.2, %v583_v54  ;;  %vm595_vm7 = vcmp.gt.f32.partialorder %v544_v55, 0.0  ;;  %v603_v57 = vmul.f32 0.2, %v544_v55  ;;  %v546_v60 = vpop.f32.mrb[6].mxu0 }
 0x122   : > { %v610_v58 = vsel %vm594_vm5, %v542_v52, %v602_v53  ;;  %vm597_vm8 = vcmp.gt.f32.partialorder %v585_v59, 0.0  ;;  %v605_v63 = vmul.f32 0.2, %v585_v59  ;;  %v587_v0 = vpop.f32.mrb[6].mxu1  ;;  %v547_v1 = vpop.f32.mrb[7].mxu0 }
 0x123   : > { %v612_v61 = vsel %vm596_vm6, %v583_v54, %v604_v56  ;;  %v611_v62 = vsel %vm595_vm7, %v544_v55, %v603_v57  ;;  %v588_v3 = vpop.f32.mrb[7].mxu1 }
 0x124   : > { %v768_v2 = vpack.c.bf16 %v611_v62, %v610_v58  ;;  %v613_v4 = vsel %vm597_vm8, %v585_v59, %v605_v63 }
 0x125   : > { %v769_v5 = vpack.c.bf16 %v613_v4, %v612_v61 }
 0x126   : > { %648 = vst [vmem:[%s990_s5 + $0x10] sm:$0xff] %v768_v2 }
 0x127   : > { %649 = vst [vmem:[%s990_s5 + $0x18] sm:$0xff] %v769_v5 }
 0x128 PF: > { %p9_p9 = scmp.ge.s32.totalorder %s852_s13, 4   ;;  %s1009_s9 = smov %s813_s10 }
 0x129   : > { %s1010_s10 = smov %s861_s16  ;;  %s1011_s11 = smov %s852_s13 }
 0x12a   :  { %11 = sbr.rel (!%p9_p9) target bundleno = 2 (0x2), region = 86 }

// kernel: discriminator_forward.5
= control target key start
LH: loop header
LB: loop body
LE: loop exit
PB: predicated region body
PF: predicated region fallthrough
CT: control target
= control target key end

     0   :  { %v550_v1 = vmov 0   ;;  %s747_s1 = inlined_call_operand.vmem [shape: bf16[128,512], index: 1, kind: input, shape index: {}]   ;;  %s748_s0 = inlined_call_operand.vmem [shape: bf16[16,128], index: 0, kind: input, shape index: {}]   ;;  %s749_s3 = inlined_call_operand.vmem [shape: f32[16,1], index: 3, kind: input, shape index: {}]   ;;  %s750_s2 = inlined_call_operand.vmem [shape: f32[16,1], index: 2, kind: input, shape index: {}]   ;;  %s751_s4 = inlined_call_operand.vmem [shape: bf16[16,512], index: 4, kind: output, shape index: {}]  }
   0x1   :  { %v497_v0 = vld [vmem:[%s747_s1 + $0x4] ss:$16 sps:$4 sm:$0xff]   ;;  %250 = vmatprep.mubr.bf16.mxu0 %v550_v1  ;;  %293 = vmatprep.mubr.bf16.mxu1 %v550_v1  ;;  %v499_v2 = vld [vmem:[%s747_s1 + $0xc] ss:$16 sps:$4 sm:$0xff]   ;;  %v501_v3 = vld [vmem:[%s747_s1] ss:$16 sps:$4 sm:$0xff]  }
   0x2   :  { %496 = vset.pattern.permute.xlu1 %v550_v1  ;;  %495 = vset.pattern.permute.xlu0 %v550_v1  ;;  %v502_v4 = vld [vmem:[%s747_s1 + $0x8] ss:$16 sps:$4 sm:$0xff]   ;;  %v503_v5 = vld [vmem:[%s747_s1 + $0x24] ss:$16 sps:$4 sm:$0xff]   ;;  %v505_v6 = vld [vmem:[%s747_s1 + $0x2c] ss:$16 sps:$4 sm:$0xff]  }
   0x3   :  { %218 = vmatprep.subr.bf16.mxu0 %v497_v0  ;;  %261 = vmatprep.subr.bf16.mxu1 %v499_v2  ;;  %v507_v7 = vld [vmem:[%s747_s1 + $0x20] ss:$16 sps:$4 sm:$0xff]   ;;  %v508_v8 = vld [vmem:[%s747_s1 + $0x28] ss:$16 sps:$4 sm:$0xff]   ;;  %v509_v9 = vld [vmem:[%s747_s1 + $0x44] ss:$16 sps:$4 sm:$0xff]  }
   0x4   :  { %219 = vmatpush1.bf16.msra.mxu0 %v501_v3  ;;  %262 = vmatpush1.bf16.msra.mxu1 %v502_v4  ;;  %v511_v10 = vld [vmem:[%s747_s1 + $0x4c] ss:$16 sps:$4 sm:$0xff]   ;;  %v513_v11 = vld [vmem:[%s747_s1 + $0x40] ss:$16 sps:$4 sm:$0xff]   ;;  %v514_v12 = vld [vmem:[%s747_s1 + $0x48] ss:$16 sps:$4 sm:$0xff]  }
   0x5   :  { %220 = vmatprep.subr.bf16.mxu0 %v503_v5  ;;  %263 = vmatprep.subr.bf16.mxu1 %v505_v6  ;;  %v515_v13 = vld [vmem:[%s747_s1 + $0x64] ss:$16 sps:$4 sm:$0xff]   ;;  %v517_v14 = vld [vmem:[%s747_s1 + $0x6c] ss:$16 sps:$4 sm:$0xff]   ;;  %v519_v15 = vld [vmem:[%s747_s1 + $0x60] ss:$16 sps:$4 sm:$0xff]  }
   0x6   :  { %v520_v16 = vld [vmem:[%s747_s1 + $0x68] ss:$16 sps:$4 sm:$0xff]   ;;  %v521_v17 = vld [vmem:[%s747_s1 + $0x84] ss:$16 sps:$4 sm:$0xff]   ;;  %v523_v18 = vld [vmem:[%s747_s1 + $0x8c] ss:$16 sps:$4 sm:$0xff]  }
   0x7   :  { %v525_v19 = vld [vmem:[%s747_s1 + $0x80] ss:$16 sps:$4 sm:$0xff]   ;;  %v526_v20 = vld [vmem:[%s747_s1 + $0x88] ss:$16 sps:$4 sm:$0xff]   ;;  %v527_v21 = vld [vmem:[%s747_s1 + $0xa4] ss:$16 sps:$4 sm:$0xff]  }
   0x8   :  { %221 = vmatpush1.bf16.msra.mxu0 %v507_v7  ;;  %264 = vmatpush1.bf16.msra.mxu1 %v508_v8  ;;  %v529_v22 = vld [vmem:[%s747_s1 + $0xac] ss:$16 sps:$4 sm:$0xff]   ;;  %v531_v23 = vld [vmem:[%s747_s1 + $0xa0] ss:$16 sps:$4 sm:$0xff]   ;;  %v532_v24 = vld [vmem:[%s747_s1 + $0xa8] ss:$16 sps:$4 sm:$0xff]  }
   0x9   :  { %222 = vmatprep.subr.bf16.mxu0 %v509_v9  ;;  %265 = vmatprep.subr.bf16.mxu1 %v511_v10  ;;  %v533_v25 = vld [vmem:[%s747_s1 + $0xc4] ss:$16 sps:$4 sm:$0xff]   ;;  %v535_v26 = vld [vmem:[%s747_s1 + $0xcc] ss:$16 sps:$4 sm:$0xff]   ;;  %v537_v27 = vld [vmem:[%s747_s1 + $0xc0] ss:$16 sps:$4 sm:$0xff]  }
   0xa   :  { %v538_v28 = vld [vmem:[%s747_s1 + $0xc8] ss:$16 sps:$4 sm:$0xff]   ;;  %v539_v29 = vld [vmem:[%s747_s1 + $0xe4] ss:$16 sps:$4 sm:$0xff]   ;;  %v541_v30 = vld [vmem:[%s747_s1 + $0xec] ss:$16 sps:$4 sm:$0xff]  }
   0xb   :  { %v543_v31 = vld [vmem:[%s747_s1 + $0xe0] ss:$16 sps:$4 sm:$0xff]   ;;  %v544_v32 = vld [vmem:[%s747_s1 + $0xe8] ss:$16 sps:$4 sm:$0xff]  }
   0xc   :  { %223 = vmatpush1.bf16.msra.mxu0 %v513_v11  ;;  %266 = vmatpush1.bf16.msra.mxu1 %v514_v12  ;;  %v545_v33 = vld [vmem:[%s748_s0] sm:$0xff]  }
   0xd   :  { %224 = vmatprep.subr.bf16.mxu0 %v515_v13  ;;  %267 = vmatprep.subr.bf16.mxu1 %v517_v14  ;;  %v377_v62 = vld [vmem:[%s749_s3] sm:$0xff] }
  0x10   :  { %225 = vmatpush1.bf16.msra.mxu0 %v519_v15  ;;  %268 = vmatpush1.bf16.msra.mxu1 %v520_v16 }
  0x11   :  { %226 = vmatprep.subr.bf16.mxu0 %v521_v17  ;;  %269 = vmatprep.subr.bf16.mxu1 %v523_v18 }
  0x14   :  { %227 = vmatpush1.bf16.msra.mxu0 %v525_v19  ;;  %270 = vmatpush1.bf16.msra.mxu1 %v526_v20 }
  0x15   :  { %228 = vmatprep.subr.bf16.mxu0 %v527_v21  ;;  %271 = vmatprep.subr.bf16.mxu1 %v529_v22 }
  0x18   :  { %229 = vmatpush1.bf16.msra.mxu0 %v531_v23  ;;  %272 = vmatpush1.bf16.msra.mxu1 %v532_v24  ;;  %v343_v23 = vld [vmem:[%s750_s2] sm:$0xff] }
  0x19   :  { %230 = vmatprep.subr.bf16.mxu0 %v533_v25  ;;  %273 = vmatprep.subr.bf16.mxu1 %v535_v26  ;;  %v344_v26 = vld [vmem:[%s750_s2 + $0x8] sm:$0xff] }
  0x1c   :  { %231 = vmatpush1.bf16.msra.mxu0 %v537_v27  ;;  %274 = vmatpush1.bf16.msra.mxu1 %v538_v28 }
  0x1d   :  { %232 = vmatprep.subr.bf16.mxu0 %v539_v29  ;;  %275 = vmatprep.subr.bf16.mxu1 %v541_v30  ;;  %v378_v29 = vld [vmem:[%s749_s3 + $0x8] sm:$0xff] }
  0x20   :  { %233 = vmatpush1.bf16.msra.mxu0 %v543_v31  ;;  %276 = vmatpush1.bf16.msra.mxu1 %v544_v32 }
  0x23   :  { %251 = vmatmul.mubr.bf16.vlgmr.msra.gmra.mrb[0].mxu0 %v545_v33  ;;  %294 = vmatmul.mubr.bf16.vlgmr.msra.gmra.mrb[0].mxu1 %v545_v33 }
  0xf6   :  { %v675_v34 = vpop.f32.mrb[0].mxu0  ;;  %v677_v35 = vpop.f32.mrb[0].mxu1 }
  0xf7   :  { %v317_v36 = vmul.f32 %v675_v34, %v675_v34  ;;  %v681_v37 = vpop.f32.mrb[1].mxu0  ;;  %v683_v38 = vpop.f32.mrb[1].mxu1  ;;  %v319_v43 = vmul.f32 %v677_v35, %v677_v35 }
  0xf8   :  { %v304_v39 = vadd.f32 %v681_v37, %v675_v34  ;;  %v318_v40 = vmul.f32 %v681_v37, %v681_v37  ;;  %v689_v41 = vpop.f32.mrb[2].mxu0  ;;  %v691_v42 = vpop.f32.mrb[2].mxu1  ;;  %v320_v55 = vmul.f32 %v683_v38, %v683_v38 }
  0xf9   :  { %v321_v44 = vmul.f32 %v689_v41, %v689_v41  ;;  %v697_v45 = vpop.f32.mrb[3].mxu0  ;;  %v699_v46 = vpop.f32.mrb[3].mxu1  ;;  %v323_v51 = vmul.f32 %v691_v42, %v691_v42 }
  0xfa   :  { %v309_v47 = vadd.f32 %v697_v45, %v689_v41  ;;  %v322_v48 = vmul.f32 %v697_v45, %v697_v45  ;;  %v305_v49 = vadd.f32 %v304_v39, %v677_v35  ;;  %v325_v50 = vadd.f32 %v318_v40, %v317_v36 }
  0xfb   :  { %v324_v57 = vmul.f32 %v699_v46, %v699_v46 }
  0xfc   :  { %v330_v52 = vadd.f32 %v322_v48, %v321_v44  ;;  %v306_v53 = vadd.f32 %v305_v49, %v683_v38  ;;  %v310_v54 = vadd.f32 %v309_v47, %v691_v42  ;;  %v326_v56 = vadd.f32 %v325_v50, %v319_v43 }
  0xfe   :  { %307 = vadd.xlane.f32.xlu0 %v306_v53  ;;  %v311_v58 = vadd.f32 %v310_v54, %v699_v46  ;;  %v331_v59 = vadd.f32 %v330_v52, %v323_v51  ;;  %v327_v60 = vadd.f32 %v326_v56, %v320_v55 }
 0x100   :  { %v332_v61 = vadd.f32 %v331_v59, %v324_v57  ;;  %328 = vadd.xlane.f32.xlu1 %v327_v60 }
 0x102   :  { %312 = vadd.xlane.f32.xlu0 %v311_v58 }
 0x104   :  { %333 = vadd.xlane.f32.xlu1 %v332_v61 }
 0x115   :  { %381 = vperm.xlu1 %496, %v377_v62  }
 0x18b   :  { %v308_v63 = vpop.xlane.xlu0 %307 }
 0x18c   :  { %v315_v0 = vmul.f32 0.001953125, %v308_v63 }
 0x18d   :  { %v329_v1 = vpop.xlane.xlu1 %328 }
 0x18e   :  { %v337_v2 = vmul.f32 %v315_v0, %v315_v0  ;;  %v351_v3 = vsub.f32 %v675_v34, %v315_v0  ;;  %v352_v4 = vsub.f32 %v681_v37, %v315_v0  ;;  %v353_v5 = vsub.f32 %v677_v35, %v315_v0 }
 0x18f   :  { %v335_v6 = vmul.f32 0.001953125, %v329_v1  ;;  %v313_v7 = vpop.xlane.xlu0 %312  ;;  %v354_v8 = vsub.f32 %v683_v38, %v315_v0 }
 0x190   :  { %v316_v9 = vmul.f32 0.001953125, %v313_v7 }
 0x191   :  { %v339_v10 = vsub.f32 %v335_v6, %v337_v2  ;;  %v334_v11 = vpop.xlane.xlu1 %333 }
 0x192   :  { %v338_v12 = vmul.f32 %v316_v9, %v316_v9  ;;  %v355_v13 = vsub.f32 %v689_v41, %v316_v9  ;;  %v356_v14 = vsub.f32 %v697_v45, %v316_v9  ;;  %v357_v15 = vsub.f32 %v691_v42, %v316_v9 }
 0x193   :  { %v341_v16 = vmax.f32 %v339_v10, 0.0  ;;  %v336_v17 = vmul.f32 0.001953125, %v334_v11  ;;  %v358_v18 = vsub.f32 %v699_v46, %v316_v9 }
 0x195   :  { %v345_v19 = vadd.f32 1e-05, %v341_v16  ;;  %v340_v20 = vsub.f32 %v336_v17, %v338_v12  ;;  %v382_v30 = vpop.permute.xlu1 %381 }
 0x197   :  { %546 = vrsqrt.f32 %v345_v19  ;;  %v342_v21 = vmax.f32 %v340_v20, 0.0 }
 0x199   :  { %v346_v22 = vadd.f32 1e-05, %v342_v21 }
 0x19b   :  { %548 = vrsqrt.f32 %v346_v22 }
 0x1a1   :  { %v547_v24 = vpop.eup %546 }
 0x1a2   :  { %v349_v25 = vmul.f32 %v547_v24, %v343_v23 }
 0x1a4   :  { %361 = vperm.xlu0 %495, %v349_v25  }
 0x1a5   :  { %v549_v27 = vpop.eup %548 }
 0x1a6   :  { %v350_v28 = vmul.f32 %v549_v27, %v344_v26 }
 0x1a8   :  { %366 = vperm.xlu1 %496, %v350_v28  }
 0x1ac   :  { %386 = vperm.xlu1 %496, %v378_v29  }
 0x223   :  { %v362_v31 = vpop.permute.xlu0 %361 }
 0x224   :  { %v369_v32 = vmul.f32 %v362_v31, %v351_v3  ;;  %v370_v33 = vmul.f32 %v362_v31, %v352_v4  ;;  %v371_v34 = vmul.f32 %v362_v31, %v353_v5  ;;  %v372_v35 = vmul.f32 %v362_v31, %v354_v8 }
 0x226   :  { %v389_v36 = vadd.f32 %v382_v30, %v369_v32  ;;  %v390_v37 = vadd.f32 %v382_v30, %v370_v33  ;;  %v391_v38 = vadd.f32 %v382_v30, %v371_v34  ;;  %v392_v39 = vadd.f32 %v382_v30, %v372_v35 }
 0x227   :  { %v367_v40 = vpop.permute.xlu1 %366 }
 0x228   :  { %vm397_vm0 = vcmp.gt.f32.partialorder %v389_v36, 0.0  ;;  %vm398_vm1 = vcmp.gt.f32.partialorder %v390_v37, 0.0  ;;  %vm399_vm2 = vcmp.gt.f32.partialorder %v391_v38, 0.0  ;;  %vm400_vm3 = vcmp.gt.f32.partialorder %v392_v39, 0.0 }
 0x229   :  { %v405_v41 = vmul.f32 0.2, %v389_v36  ;;  %v406_v42 = vmul.f32 0.2, %v390_v37  ;;  %v407_v43 = vmul.f32 0.2, %v391_v38  ;;  %v373_v45 = vmul.f32 %v367_v40, %v355_v13 }
 0x22a   :  { %v408_v44 = vmul.f32 0.2, %v392_v39  ;;  %v374_v46 = vmul.f32 %v367_v40, %v356_v14  ;;  %v375_v47 = vmul.f32 %v367_v40, %v357_v15  ;;  %v376_v51 = vmul.f32 %v367_v40, %v358_v18 }
 0x22b   :  { %v413_v48 = vsel %vm397_vm0, %v389_v36, %v405_v41  ;;  %v414_v49 = vsel %vm398_vm1, %v390_v37, %v406_v42  ;;  %v415_v50 = vsel %vm399_vm2, %v391_v38, %v407_v43  ;;  %v387_v52 = vpop.permute.xlu1 %386 }
 0x22c   :  { %v416_v53 = vsel %vm400_vm3, %v392_v39, %v408_v44  ;;  %v490_v54 = vpack.c.bf16 %v414_v49, %v413_v48  ;;  %v393_v55 = vadd.f32 %v387_v52, %v373_v45  ;;  %v394_v56 = vadd.f32 %v387_v52, %v374_v46 }
 0x22d   :  { %v491_v57 = vpack.c.bf16 %v416_v53, %v415_v50  ;;  %v395_v58 = vadd.f32 %v387_v52, %v375_v47  ;;  %v396_v59 = vadd.f32 %v387_v52, %v376_v51 }
 0x22e   :  { %445 = vst [vmem:[%s751_s4] sm:$0xff] %v490_v54  ;;  %vm401_vm4 = vcmp.gt.f32.partialorder %v393_v55, 0.0  ;;  %vm402_vm5 = vcmp.gt.f32.partialorder %v394_v56, 0.0  ;;  %v409_v60 = vmul.f32 0.2, %v393_v55  ;;  %v410_v61 = vmul.f32 0.2, %v394_v56 }
 0x22f   :  { %446 = vst [vmem:[%s751_s4 + $0x8] sm:$0xff] %v491_v57  ;;  %vm403_vm6 = vcmp.gt.f32.partialorder %v395_v58, 0.0  ;;  %vm404_vm7 = vcmp.gt.f32.partialorder %v396_v59, 0.0  ;;  %v411_v62 = vmul.f32 0.2, %v395_v58 }
 0x230   :  { %v412_v63 = vmul.f32 0.2, %v396_v59  ;;  %v417_v0 = vsel %vm401_vm4, %v393_v55, %v409_v60  ;;  %v418_v1 = vsel %vm402_vm5, %v394_v56, %v410_v61 }
 0x231   :  { %v419_v2 = vsel %vm403_vm6, %v395_v58, %v411_v62  ;;  %v492_v4 = vpack.c.bf16 %v418_v1, %v417_v0 }
 0x232   :  { %v420_v3 = vsel %vm404_vm7, %v396_v59, %v412_v63 }
 0x233   :  { %v493_v5 = vpack.c.bf16 %v420_v3, %v419_v2  ;;  %447 = vst [vmem:[%s751_s4 + $0x10] sm:$0xff] %v492_v4 }
 0x235   :  { %448 = vst [vmem:[%s751_s4 + $0x18] sm:$0xff] %v493_v5 }

// kernel: discriminator_forward.6
= control target key start
LH: loop header
LB: loop body
LE: loop exit
PB: predicated region body
PF: predicated region fallthrough
CT: control target
= control target key end

     0   :  { %v484_v36 = vmov 0   ;;  %s634_s1 = inlined_call_operand.vmem [shape: bf16[256,128], index: 1, kind: input, shape index: {}]   ;;  %s635_s0 = inlined_call_operand.vmem [shape: bf16[32,256], index: 0, kind: input, shape index: {}]   ;;  %s636_s3 = inlined_call_operand.vmem [shape: f32[32,1], index: 3, kind: input, shape index: {}]   ;;  %s637_s2 = inlined_call_operand.vmem [shape: f32[32,1], index: 2, kind: input, shape index: {}]   ;;  %s638_s4 = inlined_call_operand.vmem [shape: bf16[32,128], index: 4, kind: output, shape index: {}]  }
   0x1   :  { %v454_v0 = vld [vmem:[%s634_s1 + $0x40] sm:$0xff]   ;;  %v456_v2 = vld [vmem:[%s634_s1 + $0x48] sm:$0xff]   ;;  %v458_v4 = vld [vmem:[%s634_s1 + $0x50] sm:$0xff]   ;;  %453 = vset.pattern.permute.xlu1 %v484_v36  ;;  %452 = vset.pattern.permute.xlu0 %v484_v36 }
   0x2   :  { %v455_v1 = vld [vmem:[%s634_s1] sm:$0xff]   ;;  %407 = vmatprep.subr.bf16.mxu0 %v454_v0  ;;  %435 = vmatprep.subr.bf16.mxu1 %v454_v0  ;;  %v457_v3 = vld [vmem:[%s634_s1 + $0x8] sm:$0xff]   ;;  %v459_v5 = vld [vmem:[%s634_s1 + $0x10] sm:$0xff]  }
   0x3   :  { %408 = vmatpush3.bf16.msra.mxu0 %v455_v1  ;;  %443 = vmatpush3.bf16.msra.mxu1 %v455_v1  ;;  %v460_v6 = vld [vmem:[%s634_s1 + $0x58] sm:$0xff]   ;;  %v462_v8 = vld [vmem:[%s634_s1 + $0x60] sm:$0xff]   ;;  %v464_v10 = vld [vmem:[%s634_s1 + $0x68] sm:$0xff]  }
   0x4   :  { %409 = vmatprep.subr.bf16.mxu0 %v456_v2  ;;  %436 = vmatprep.subr.bf16.mxu1 %v456_v2  ;;  %v461_v7 = vld [vmem:[%s634_s1 + $0x18] sm:$0xff]   ;;  %v463_v9 = vld [vmem:[%s634_s1 + $0x20] sm:$0xff]   ;;  %v465_v13 = vld [vmem:[%s634_s1 + $0x28] sm:$0xff]  }
   0x5   :  { %v472_v11 = vld [vmem:[%s635_s0 + $0x4] ss:$8 sps:$4 sm:$0xff]   ;;  %v475_v12 = vld [vmem:[%s635_s0 + $0x14] ss:$8 sps:$4 sm:$0xff]   ;;  %v470_v18 = vld [vmem:[%s635_s0] ss:$8 sps:$4 sm:$0xff]  }
   0x6   :  { %v466_v14 = vld [vmem:[%s634_s1 + $0x70] sm:$0xff]   ;;  %202 = vmatprep.mubr.bf16.mxu0 %v472_v11  ;;  %210 = vmatprep.mubr.bf16.mxu1 %v475_v12  ;;  %v468_v16 = vld [vmem:[%s634_s1 + $0x78] sm:$0xff]   ;;  %v304_v37 = vld [vmem:[%s636_s3] sm:$0xff] }
   0x7   :  { %410 = vmatpush3.bf16.msra.mxu0 %v457_v3  ;;  %444 = vmatpush3.bf16.msra.mxu1 %v457_v3  ;;  %v467_v15 = vld [vmem:[%s634_s1 + $0x30] sm:$0xff]   ;;  %v469_v17 = vld [vmem:[%s634_s1 + $0x38] sm:$0xff]   ;;  %v305_v38 = vld [vmem:[%s636_s3 + $0x8] sm:$0xff] }
   0x8   :  { %411 = vmatprep.subr.bf16.mxu0 %v458_v4  ;;  %437 = vmatprep.subr.bf16.mxu1 %v458_v4  ;;  %v473_v19 = vld [vmem:[%s635_s0 + $0x10] ss:$8 sps:$4 sm:$0xff]  }
   0x9   :  { %v306_v39 = vld [vmem:[%s636_s3 + $0x10] sm:$0xff] }
   0xa   :  { %v262_v11 = vld [vmem:[%s637_s2 + $0x10] sm:$0xff] }
   0xb   :  { %412 = vmatpush3.bf16.msra.mxu0 %v459_v5  ;;  %445 = vmatpush3.bf16.msra.mxu1 %v459_v5 }
   0xc   :  { %413 = vmatprep.subr.bf16.mxu0 %v460_v6  ;;  %438 = vmatprep.subr.bf16.mxu1 %v460_v6 }
   0xf   :  { %414 = vmatpush3.bf16.msra.mxu0 %v461_v7  ;;  %446 = vmatpush3.bf16.msra.mxu1 %v461_v7 }
  0x10   :  { %415 = vmatprep.subr.bf16.mxu0 %v462_v8  ;;  %439 = vmatprep.subr.bf16.mxu1 %v462_v8  ;;  %v260_v8 = vld [vmem:[%s637_s2] sm:$0xff] }
  0x13   :  { %416 = vmatpush3.bf16.msra.mxu0 %v463_v9  ;;  %447 = vmatpush3.bf16.msra.mxu1 %v463_v9 }
  0x14   :  { %417 = vmatprep.subr.bf16.mxu0 %v464_v10  ;;  %440 = vmatprep.subr.bf16.mxu1 %v464_v10 }
  0x17   :  { %418 = vmatpush3.bf16.msra.mxu0 %v465_v13  ;;  %448 = vmatpush3.bf16.msra.mxu1 %v465_v13 }
  0x18   :  { %419 = vmatprep.subr.bf16.mxu0 %v466_v14  ;;  %441 = vmatprep.subr.bf16.mxu1 %v466_v14 }
  0x1b   :  { %420 = vmatpush3.bf16.msra.mxu0 %v467_v15  ;;  %449 = vmatpush3.bf16.msra.mxu1 %v467_v15  ;;  %v261_v15 = vld [vmem:[%s637_s2 + $0x8] sm:$0xff] }
  0x1c   :  { %421 = vmatprep.subr.bf16.mxu0 %v468_v16  ;;  %442 = vmatprep.subr.bf16.mxu1 %v468_v16 }
  0x1f   :  { %422 = vmatpush3.bf16.msra.mxu0 %v469_v17  ;;  %450 = vmatpush3.bf16.msra.mxu1 %v469_v17 }
  0x22   :  { %203 = vmatmul.mubr.bf16.vlgmr.msra.gmra.mrb[0].mxu0 %v470_v18  ;;  %211 = vmatmul.mubr.bf16.vlgmr.msra.gmra.mrb[0].mxu1 %v473_v19  ;;  %v263_v18 = vld [vmem:[%s637_s2 + $0x18] sm:$0xff] }
  0xf5   :  { %v423_v20 = vpop.f32.mrb[0].mxu0  ;;  %v429_v21 = vpop.f32.mrb[0].mxu1 }
  0xf6   :  { %v424_v22 = vpop.f32.mrb[1].mxu0  ;;  %v430_v23 = vpop.f32.mrb[1].mxu1 }
  0xf7   :  { %v570_v24 = vadd.f32 %v424_v22, %v423_v20  ;;  %v572_v25 = vadd.f32 %v430_v23, %v429_v21  ;;  %v426_v26 = vpop.f32.mrb[2].mxu0  ;;  %v432_v27 = vpop.f32.mrb[2].mxu1  ;;  %v307_v20 = vld [vmem:[%s636_s3 + $0x18] sm:$0xff] }
  0xf8   :  { %v427_v28 = vpop.f32.mrb[3].mxu0  ;;  %v433_v29 = vpop.f32.mrb[3].mxu1 }
  0xf9   :  { %v574_v30 = vadd.f32 %v427_v28, %v426_v26  ;;  %223 = vadd.xlane.f32.xlu1 %v572_v25  ;;  %219 = vadd.xlane.f32.xlu0 %v570_v24  ;;  %v578_v31 = vadd.f32 %v433_v29, %v432_v27  ;;  %v232_v33 = vmul.f32 %v570_v24, %v570_v24 }
  0xfa   :  { %v234_v35 = vmul.f32 %v572_v25, %v572_v25 }
  0xfb   :  { %v233_v32 = vmul.f32 %v574_v30, %v574_v30  ;;  %v235_v34 = vmul.f32 %v578_v31, %v578_v31 }
  0xfd   :  { %225 = vadd.xlane.f32.xlu1 %v578_v31  ;;  %221 = vadd.xlane.f32.xlu0 %v574_v30 }
 0x101   :  { %238 = vadd.xlane.f32.xlu1 %v233_v32  ;;  %236 = vadd.xlane.f32.xlu0 %v232_v33 }
 0x105   :  { %242 = vadd.xlane.f32.xlu1 %v235_v34  ;;  %240 = vadd.xlane.f32.xlu0 %v234_v35 }
 0x116   :  { %310 = vperm.xlu1 %453, %v304_v37  }
 0x11a   :  { %315 = vperm.xlu1 %453, %v305_v38  }
 0x11e   :  { %320 = vperm.xlu1 %453, %v306_v39  }
 0x186   :  { %v224_v40 = vpop.xlane.xlu1 %223  ;;  %v220_v41 = vpop.xlane.xlu0 %219 }
 0x187   :  { %v228_v44 = vmul.f32 0.0078125, %v220_v41  ;;  %v230_v52 = vmul.f32 0.0078125, %v224_v40 }
 0x189   :  { %v248_v48 = vmul.f32 %v228_v44, %v228_v44  ;;  %v250_v58 = vmul.f32 %v230_v52, %v230_v52  ;;  %v276_v27 = vsub.f32 %v570_v24, %v228_v44  ;;  %v278_v33 = vsub.f32 %v572_v25, %v230_v52 }
 0x18a   :  { %v226_v42 = vpop.xlane.xlu1 %225  ;;  %v222_v43 = vpop.xlane.xlu0 %221 }
 0x18b   :  { %v599_v45 = vmul.f32 0.0078125, %v222_v43  ;;  %v603_v54 = vmul.f32 0.0078125, %v226_v42 }
 0x18d   :  { %v249_v51 = vmul.f32 %v599_v45, %v599_v45  ;;  %v251_v62 = vmul.f32 %v603_v54, %v603_v54  ;;  %v277_v34 = vsub.f32 %v574_v30, %v599_v45  ;;  %v279_v24 = vsub.f32 %v578_v31, %v603_v54 }
 0x18e   :  { %v239_v46 = vpop.xlane.xlu1 %238  ;;  %v237_v47 = vpop.xlane.xlu0 %236 }
 0x18f   :  { %v245_v49 = vmul.f32 0.0078125, %v239_v46  ;;  %v244_v50 = vmul.f32 0.0078125, %v237_v47 }
 0x191   :  { %v252_v53 = vsub.f32 %v244_v50, %v248_v48  ;;  %v253_v55 = vsub.f32 %v245_v49, %v249_v51 }
 0x192   :  { %v243_v56 = vpop.xlane.xlu1 %242  ;;  %v241_v57 = vpop.xlane.xlu0 %240 }
 0x193   :  { %v256_v59 = vmax.f32 %v252_v53, 0.0  ;;  %v247_v60 = vmul.f32 0.0078125, %v243_v56  ;;  %v246_v61 = vmul.f32 0.0078125, %v241_v57  ;;  %v257_v1 = vmax.f32 %v253_v55, 0.0 }
 0x195   :  { %v264_v63 = vadd.f32 1e-05, %v256_v59  ;;  %v254_v0 = vsub.f32 %v246_v61, %v250_v58  ;;  %v255_v2 = vsub.f32 %v247_v60, %v251_v62  ;;  %v265_v5 = vadd.f32 1e-05, %v257_v1 }
 0x196   :  { %v311_v21 = vpop.permute.xlu1 %310 }
 0x197   :  { %v258_v3 = vmax.f32 %v254_v0, 0.0  ;;  %476 = vrsqrt.f32 %v264_v63  ;;  %v259_v6 = vmax.f32 %v255_v2, 0.0 }
 0x199   :  { %v266_v4 = vadd.f32 1e-05, %v258_v3  ;;  %v267_v7 = vadd.f32 1e-05, %v259_v6 }
 0x19a   :  { %v316_v22 = vpop.permute.xlu1 %315 }
 0x19b   :  { %478 = vrsqrt.f32 %v266_v4 }
 0x19c   :  { %480 = vrsqrt.f32 %v265_v5 }
 0x19d   :  { %482 = vrsqrt.f32 %v267_v7 }
 0x19e   :  { %v321_v23 = vpop.permute.xlu1 %320 }
 0x1a1   :  { %v477_v9 = vpop.eup %476 }
 0x1a2   :  { %v272_v10 = vmul.f32 %v477_v9, %v260_v8 }
 0x1a4   :  { %282 = vperm.xlu0 %452, %v272_v10  }
 0x1a5   :  { %v479_v12 = vpop.eup %478 }
 0x1a6   :  { %v274_v13 = vmul.f32 %v479_v12, %v262_v11  ;;  %v481_v14 = vpop.eup %480 }
 0x1a7   :  { %v273_v16 = vmul.f32 %v481_v14, %v261_v15  ;;  %v483_v17 = vpop.eup %482 }
 0x1a8   :  { %292 = vperm.xlu1 %453, %v274_v13   ;;  %v275_v19 = vmul.f32 %v483_v17, %v263_v18 }
 0x1ac   :  { %287 = vperm.xlu1 %453, %v273_v16  }
 0x1b0   :  { %297 = vperm.xlu1 %453, %v275_v19  }
 0x1b4   :  { %325 = vperm.xlu1 %453, %v307_v20  }
 0x223   :  { %v283_v26 = vpop.permute.xlu0 %282 }
 0x224   :  { %v300_v28 = vmul.f32 %v283_v26, %v276_v27 }
 0x226   :  { %v328_v32 = vadd.f32 %v311_v21, %v300_v28 }
 0x227   :  { %v293_v29 = vpop.permute.xlu1 %292 }
 0x228   :  { %v302_v36 = vmul.f32 %v293_v29, %v278_v33  ;;  %v336_v38 = vmul.f32 0.2, %v328_v32  ;;  %vm332_vm0 = vcmp.gt.f32.partialorder %v328_v32, 0.0 }
 0x22a   :  { %v330_v41 = vadd.f32 %v321_v23, %v302_v36  ;;  %v340_v43 = vsel %vm332_vm0, %v328_v32, %v336_v38 }
 0x22b   :  { %v288_v35 = vpop.permute.xlu1 %287 }
 0x22c   :  { %v301_v37 = vmul.f32 %v288_v35, %v277_v34  ;;  %v338_v48 = vmul.f32 0.2, %v330_v41  ;;  %vm334_vm2 = vcmp.gt.f32.partialorder %v330_v41, 0.0 }
 0x22e   :  { %v329_v39 = vadd.f32 %v316_v22, %v301_v37  ;;  %v342_v49 = vsel %vm334_vm2, %v330_v41, %v338_v48 }
 0x22f   :  { %v298_v40 = vpop.permute.xlu1 %297 }
 0x230   :  { %vm333_vm1 = vcmp.gt.f32.partialorder %v329_v39, 0.0  ;;  %v337_v42 = vmul.f32 0.2, %v329_v39  ;;  %v303_v46 = vmul.f32 %v298_v40, %v279_v24 }
 0x232   :  { %v341_v44 = vsel %vm333_vm1, %v329_v39, %v337_v42 }
 0x233   :  { %v399_v25 = vpack.c.bf16 %v341_v44, %v340_v43  ;;  %v326_v47 = vpop.permute.xlu1 %325 }
 0x234   :  { %v331_v30 = vadd.f32 %v326_v47, %v303_v46 }
 0x235   :  { %400 = vst [vmem:[%s638_s4] sm:$0xff] %v399_v25  }
 0x236   :  { %vm335_vm3 = vcmp.gt.f32.partialorder %v331_v30, 0.0  ;;  %v339_v45 = vmul.f32 0.2, %v331_v30 }
 0x238   :  { %v343_v50 = vsel %vm335_vm3, %v331_v30, %v339_v45 }
 0x239   :  { %v404_v51 = vpack.c.bf16 %v343_v50, %v342_v49 }
 0x23b   :  { %406 = vst [vmem:[%s638_s4 + $0x8] sm:$0xff] %v404_v51  }

// kernel: discriminator_forward.7
= control target key start
LH: loop header
LB: loop body
LE: loop exit
PB: predicated region body
PF: predicated region fallthrough
CT: control target
= control target key end

     0   :  { %s1560_s0 = inlined_call_operand.vmem [shape: bf16[64,512], index: 0, kind: input, shape index: {}]   ;;  %s1561_s1 = inlined_call_operand.vmem [shape: bf16[512,32], index: 1, kind: input, shape index: {}]   ;;  %s1562_s2 = inlined_call_operand.vmem [shape: f32[64,1], index: 2, kind: input, shape index: {}]   ;;  %s1563_s3 = inlined_call_operand.vmem [shape: f32[64,1], index: 3, kind: input, shape index: {}]   ;;  %s1564_s4 = inlined_call_operand.vmem [shape: f32[64,32], index: 4, kind: input, shape index: {}]   ;;  %s1565_s5 = inlined_call_operand.vmem [shape: f32[32,2], index: 5, kind: input, shape index: {}]   ;;  %s1566_s6 = inlined_call_operand.hbm [shape: f32[1,2], index: 6, kind: output, shape index: {}]  }
   0x1   :  { %v1067_v0 = vld [vmem:[%s1561_s1 + $0x40] sm:$0xff]   ;;  %v1071_v4 = vld [vmem:[%s1561_s1 + $0x48] sm:$0xff]   ;;  %v1075_v8 = vld [vmem:[%s1561_s1 + $0x50] sm:$0xff]  }
   0x2   :  { %v1068_v1 = vld [vmem:[%s1561_s1 + $0xc0] sm:$0xff]   ;;  %958 = vmatprep.subr.bf16.mxu0 %v1067_v0  ;;  %v1072_v5 = vld [vmem:[%s1561_s1 + $0xc8] sm:$0xff]   ;;  %v1076_v9 = vld [vmem:[%s1561_s1 + $0xd0] sm:$0xff]  }
   0x3   :  { %v1069_v2 = vld [vmem:[%s1561_s1] sm:$0xff]   ;;  %998 = vmatprep.subr.bf16.mxu1 %v1068_v1  ;;  %v1073_v6 = vld [vmem:[%s1561_s1 + $0x8] sm:$0xff]   ;;  %v1077_v10 = vld [vmem:[%s1561_s1 + $0x10] sm:$0xff]  }
   0x4   :  { %v1070_v3 = vld [vmem:[%s1561_s1 + $0x80] sm:$0xff]   ;;  %959 = vmatpush3.bf16.msra.mxu0 %v1069_v2  ;;  %v1074_v7 = vld [vmem:[%s1561_s1 + $0x88] sm:$0xff]   ;;  %v1078_v11 = vld [vmem:[%s1561_s1 + $0x90] sm:$0xff]  }
   0x5   :  { %999 = vmatpush3.bf16.msra.mxu1 %v1070_v3  ;;  %960 = vmatprep.subr.bf16.mxu0 %v1071_v4  ;;  %v1079_v12 = vld [vmem:[%s1561_s1 + $0x58] sm:$0xff]   ;;  %v1083_v16 = vld [vmem:[%s1561_s1 + $0x60] sm:$0xff]   ;;  %v1087_v20 = vld [vmem:[%s1561_s1 + $0x68] sm:$0xff]  }
   0x6   :  { %1000 = vmatprep.subr.bf16.mxu1 %v1072_v5  ;;  %v1080_v13 = vld [vmem:[%s1561_s1 + $0xd8] sm:$0xff]   ;;  %v1084_v17 = vld [vmem:[%s1561_s1 + $0xe0] sm:$0xff]   ;;  %v1088_v21 = vld [vmem:[%s1561_s1 + $0xe8] sm:$0xff]  }
   0x7   :  { %v1081_v14 = vld [vmem:[%s1561_s1 + $0x18] sm:$0xff]   ;;  %v1085_v18 = vld [vmem:[%s1561_s1 + $0x20] sm:$0xff]   ;;  %v1089_v22 = vld [vmem:[%s1561_s1 + $0x28] sm:$0xff]  }
   0x8   :  { %961 = vmatpush3.bf16.msra.mxu0 %v1073_v6  ;;  %v1082_v15 = vld [vmem:[%s1561_s1 + $0x98] sm:$0xff]   ;;  %v1086_v19 = vld [vmem:[%s1561_s1 + $0xa0] sm:$0xff]   ;;  %v1090_v23 = vld [vmem:[%s1561_s1 + $0xa8] sm:$0xff]  }
   0x9   :  { %1001 = vmatpush3.bf16.msra.mxu1 %v1074_v7  ;;  %962 = vmatprep.subr.bf16.mxu0 %v1075_v8  ;;  %v1091_v24 = vld [vmem:[%s1561_s1 + $0x70] sm:$0xff]   ;;  %v1095_v28 = vld [vmem:[%s1561_s1 + $0x78] sm:$0xff]  }
   0xa   :  { %1002 = vmatprep.subr.bf16.mxu1 %v1076_v9  ;;  %v1092_v25 = vld [vmem:[%s1561_s1 + $0xf0] sm:$0xff]   ;;  %v1096_v29 = vld [vmem:[%s1561_s1 + $0xf8] sm:$0xff]  }
   0xb   :  { %v1093_v26 = vld [vmem:[%s1561_s1 + $0x30] sm:$0xff]   ;;  %v1097_v30 = vld [vmem:[%s1561_s1 + $0x38] sm:$0xff]  }
   0xc   :  { %963 = vmatpush3.bf16.msra.mxu0 %v1077_v10  ;;  %v1094_v27 = vld [vmem:[%s1561_s1 + $0xb0] sm:$0xff]   ;;  %v1098_v31 = vld [vmem:[%s1561_s1 + $0xb8] sm:$0xff]  }
   0xd   :  { %1003 = vmatpush3.bf16.msra.mxu1 %v1078_v11  ;;  %964 = vmatprep.subr.bf16.mxu0 %v1079_v12  ;;  %v1099_v32 = vld [vmem:[%s1560_s0] ss:$16 sps:$4 sm:$0xff]   ;;  %v1101_v33 = vld [vmem:[%s1560_s0 + $0x4] ss:$16 sps:$4 sm:$0xff]   ;;  %v1102_v34 = vld [vmem:[%s1560_s0 + $0x8] ss:$16 sps:$4 sm:$0xff]  }
   0xe   :  { %1004 = vmatprep.subr.bf16.mxu1 %v1080_v13  ;;  %v1104_v35 = vld [vmem:[%s1560_s0 + $0xc] ss:$16 sps:$4 sm:$0xff]   ;;  %409 = vmatprep.mubr.bf16.mxu0 %v1101_v33  ;;  %v1105_v36 = vld [vmem:[%s1560_s0 + $0x24] ss:$16 sps:$4 sm:$0xff]   ;;  %v1109_v38 = vld [vmem:[%s1560_s0 + $0x20] ss:$16 sps:$4 sm:$0xff]  }
   0xf   :  { %474 = vmatprep.mubr.bf16.mxu1 %v1104_v35  ;;  %v1107_v37 = vld [vmem:[%s1560_s0 + $0x2c] ss:$16 sps:$4 sm:$0xff]   ;;  %v1110_v39 = vld [vmem:[%s1560_s0 + $0x28] ss:$16 sps:$4 sm:$0xff]   ;;  %v1111_v40 = vld [vmem:[%s1560_s0 + $0x44] ss:$16 sps:$4 sm:$0xff]  }
  0x10   :  { %965 = vmatpush3.bf16.msra.mxu0 %v1081_v14  ;;  %v1113_v41 = vld [vmem:[%s1560_s0 + $0x4c] ss:$16 sps:$4 sm:$0xff]  }
  0x11   :  { %1005 = vmatpush3.bf16.msra.mxu1 %v1082_v15  ;;  %966 = vmatprep.subr.bf16.mxu0 %v1083_v16 }
  0x12   :  { %1006 = vmatprep.subr.bf16.mxu1 %v1084_v17 }
  0x14   :  { %967 = vmatpush3.bf16.msra.mxu0 %v1085_v18 }
  0x15   :  { %1007 = vmatpush3.bf16.msra.mxu1 %v1086_v19  ;;  %968 = vmatprep.subr.bf16.mxu0 %v1087_v20 }
  0x16   :  { %1008 = vmatprep.subr.bf16.mxu1 %v1088_v21 }
  0x18   :  { %969 = vmatpush3.bf16.msra.mxu0 %v1089_v22 }
  0x19   :  { %1009 = vmatpush3.bf16.msra.mxu1 %v1090_v23  ;;  %970 = vmatprep.subr.bf16.mxu0 %v1091_v24 }
  0x1a   :  { %1010 = vmatprep.subr.bf16.mxu1 %v1092_v25 }
  0x1c   :  { %971 = vmatpush3.bf16.msra.mxu0 %v1093_v26 }
  0x1d   :  { %1011 = vmatpush3.bf16.msra.mxu1 %v1094_v27  ;;  %972 = vmatprep.subr.bf16.mxu0 %v1095_v28 }
  0x1e   :  { %1012 = vmatprep.subr.bf16.mxu1 %v1096_v29 }
  0x20   :  { %973 = vmatpush3.bf16.msra.mxu0 %v1097_v30 }
  0x21   :  { %1013 = vmatpush3.bf16.msra.mxu1 %v1098_v31 }
  0x23   :  { %410 = vmatmul.mubr.bf16.vlgmr.msra.gmra.mrb[0].mxu0 %v1099_v32 }
  0x24   :  { %475 = vmatmul.mubr.bf16.vlgmr.msra.gmra.mrb[0].mxu1 %v1102_v34  ;;  %417 = vmatprep.mubr.bf16.mxu0 %v1105_v36 }
  0x25   :  { %482 = vmatprep.mubr.bf16.mxu1 %v1107_v37 }
  0x26   :  { %11 = vsyncpa [#allocation3], 0  ;;  %v1115_v42 = vld [vmem:[%s1560_s0 + $0x40] ss:$16 sps:$4 sm:$0xff]   ;;  %v1116_v43 = vld [vmem:[%s1560_s0 + $0x48] ss:$16 sps:$4 sm:$0xff]  }
  0x27   :  { %v1117_v44 = vld [vmem:[%s1560_s0 + $0x64] ss:$16 sps:$4 sm:$0xff]   ;;  %v1119_v45 = vld [vmem:[%s1560_s0 + $0x6c] ss:$16 sps:$4 sm:$0xff]   ;;  %v1121_v46 = vld [vmem:[%s1560_s0 + $0x60] ss:$16 sps:$4 sm:$0xff]  }
  0x28   :  { %v1122_v47 = vld [vmem:[%s1560_s0 + $0x68] ss:$16 sps:$4 sm:$0xff]   ;;  %v1167_v48 = vmov 0   ;;  %vm507_vm0 = vcmask 261120   ;;  %vm1169_vm1 = vmmov 0   ;;  %vm893_vm10 = vcmask 8192  }
  0x29   :  { %1065 = vset.pattern.permute.xlu1 %v1167_v48  ;;  %1066 = vset.pattern.permute.xlu0 %v1167_v48 }
  0x2b   :  { %418 = vmatmul.mubr.bf16.gmra.mrb[4].mxu0 %v1109_v38 }
  0x2c   :  { %483 = vmatmul.mubr.bf16.gmra.mrb[4].mxu1 %v1110_v39  ;;  %425 = vmatprep.mubr.bf16.mxu0 %v1111_v40 }
  0x2d   :  { %490 = vmatprep.mubr.bf16.mxu1 %v1113_v41 }
  0x33   :  { %426 = vmatmul.mubr.bf16.gmra.mrb[8].mxu0 %v1115_v42 }
  0x34   :  { %491 = vmatmul.mubr.bf16.gmra.mrb[8].mxu1 %v1116_v43  ;;  %433 = vmatprep.mubr.bf16.mxu0 %v1117_v44 }
  0x35   :  { %498 = vmatprep.mubr.bf16.mxu1 %v1119_v45 }
  0x3b   :  { %434 = vmatmul.mubr.bf16.gmra.mrb[12].mxu0 %v1121_v46 }
  0x3c   :  { %499 = vmatmul.mubr.bf16.gmra.mrb[12].mxu1 %v1122_v47 }
  0xf6   :  { %v974_v49 = vpop.f32.mrb[0].mxu0 }
  0xf7   :  { %v1014_v50 = vpop.f32.mrb[0].mxu1  ;;  %v975_v51 = vpop.f32.mrb[1].mxu0 }
  0xf8   :  { %v976_v52 = vadd.f32 %v975_v51, %v974_v49  ;;  %v1015_v53 = vpop.f32.mrb[1].mxu1  ;;  %v977_v54 = vpop.f32.mrb[2].mxu0 }
  0xf9   :  { %v1016_v55 = vadd.f32 %v1015_v53, %v1014_v50  ;;  %v1017_v56 = vpop.f32.mrb[2].mxu1  ;;  %v978_v57 = vpop.f32.mrb[3].mxu0 }
  0xfa   :  { %v979_v58 = vadd.f32 %v978_v57, %v977_v54  ;;  %v1018_v59 = vpop.f32.mrb[3].mxu1 }
  0xfb   :  { %v1351_v60 = vadd.f32 %v1016_v55, %v976_v52  ;;  %v1019_v61 = vadd.f32 %v1018_v59, %v1017_v56 }
  0xfd   :  { %v1353_v62 = vadd.f32 %v1019_v61, %v979_v58  ;;  %v508_v63 = vsel %vm507_vm0, %v1351_v60, 0.0  ;;  %v541_v0 = vmul.f32 %v1351_v60, %v1351_v60 }
  0xfe   :  { %509 = vadd.xlane.f32.xlu0 %v508_v63  ;;  %v980_v1 = vpop.f32.mrb[4].mxu0 }
  0xff   :  { %v1020_v2 = vpop.f32.mrb[4].mxu1  ;;  %v981_v3 = vpop.f32.mrb[5].mxu0  ;;  %v549_v4 = vsel %vm507_vm0, %v541_v0, 0.0  ;;  %v511_v11 = vsel %vm507_vm0, %v1353_v62, 0.0  ;;  %v542_v12 = vmul.f32 %v1353_v62, %v1353_v62 }
 0x100   :  { %v982_v5 = vadd.f32 %v981_v3, %v980_v1  ;;  %v1021_v6 = vpop.f32.mrb[5].mxu1  ;;  %550 = vadd.xlane.f32.xlu1 %v549_v4  ;;  %v983_v7 = vpop.f32.mrb[6].mxu0  ;;  %v693_v3 = vld [vmem:[%s1563_s3] sm:$0xff]  ;;  %v694_v4 = vld [vmem:[%s1563_s3 + $0x8] sm:$0xff] }
 0x101   :  { %v1022_v8 = vadd.f32 %v1021_v6, %v1020_v2  ;;  %v1023_v9 = vpop.f32.mrb[6].mxu1  ;;  %v984_v10 = vpop.f32.mrb[7].mxu0  ;;  %v552_v19 = vsel %vm507_vm0, %v542_v12, 0.0  ;;  %v696_v6 = vld [vmem:[%s1563_s3 + $0x18] sm:$0xff] }
 0x102   :  { %v985_v13 = vadd.f32 %v984_v10, %v983_v7  ;;  %v1024_v14 = vpop.f32.mrb[7].mxu1  ;;  %512 = vadd.xlane.f32.xlu0 %v511_v11  ;;  %v697_v7 = vld [vmem:[%s1563_s3 + $0x20] sm:$0xff] }
 0x103   :  { %v1364_v15 = vadd.f32 %v1022_v8, %v982_v5  ;;  %v1025_v16 = vadd.f32 %v1024_v14, %v1023_v9  ;;  %v695_v5 = vld [vmem:[%s1563_s3 + $0x10] sm:$0xff] }
 0x105   :  { %v1366_v17 = vadd.f32 %v1025_v16, %v985_v13  ;;  %v514_v18 = vsel %vm507_vm0, %v1364_v15, 0.0  ;;  %v543_v20 = vmul.f32 %v1364_v15, %v1364_v15 }
 0x106   :  { %515 = vadd.xlane.f32.xlu1 %v514_v18  ;;  %553 = vadd.xlane.f32.xlu0 %v552_v19  ;;  %v986_v21 = vpop.f32.mrb[8].mxu0 }
 0x107   :  { %v1026_v22 = vpop.f32.mrb[8].mxu1  ;;  %v987_v23 = vpop.f32.mrb[9].mxu0  ;;  %v517_v30 = vsel %vm507_vm0, %v1366_v17, 0.0  ;;  %v555_v31 = vsel %vm507_vm0, %v543_v20, 0.0  ;;  %v544_v32 = vmul.f32 %v1366_v17, %v1366_v17 }
 0x108   :  { %v988_v24 = vadd.f32 %v987_v23, %v986_v21  ;;  %v1027_v25 = vpop.f32.mrb[9].mxu1  ;;  %v989_v26 = vpop.f32.mrb[10].mxu0 }
 0x109   :  { %v1028_v27 = vadd.f32 %v1027_v25, %v1026_v22  ;;  %v1029_v28 = vpop.f32.mrb[10].mxu1  ;;  %v990_v29 = vpop.f32.mrb[11].mxu0  ;;  %v558_v39 = vsel %vm507_vm0, %v544_v32, 0.0 }
 0x10a   :  { %v991_v33 = vadd.f32 %v990_v29, %v989_v26  ;;  %v1030_v34 = vpop.f32.mrb[11].mxu1  ;;  %518 = vadd.xlane.f32.xlu1 %v517_v30  ;;  %556 = vadd.xlane.f32.xlu0 %v555_v31 }
 0x10b   :  { %v1378_v35 = vadd.f32 %v1028_v27, %v988_v24  ;;  %v1031_v36 = vadd.f32 %v1030_v34, %v1029_v28 }
 0x10d   :  { %v1380_v37 = vadd.f32 %v1031_v36, %v991_v33  ;;  %v520_v38 = vsel %vm507_vm0, %v1378_v35, 0.0  ;;  %v545_v40 = vmul.f32 %v1378_v35, %v1378_v35 }
 0x10e   :  { %521 = vadd.xlane.f32.xlu1 %v520_v38  ;;  %559 = vadd.xlane.f32.xlu0 %v558_v39  ;;  %v992_v41 = vpop.f32.mrb[12].mxu0 }
 0x10f   :  { %v1032_v42 = vpop.f32.mrb[12].mxu1  ;;  %v993_v43 = vpop.f32.mrb[13].mxu0  ;;  %v523_v50 = vsel %vm507_vm0, %v1380_v37, 0.0  ;;  %v561_v51 = vsel %vm507_vm0, %v545_v40, 0.0  ;;  %v546_v52 = vmul.f32 %v1380_v37, %v1380_v37 }
 0x110   :  { %v994_v44 = vadd.f32 %v993_v43, %v992_v41  ;;  %v1033_v45 = vpop.f32.mrb[13].mxu1  ;;  %v995_v46 = vpop.f32.mrb[14].mxu0 }
 0x111   :  { %v1034_v47 = vadd.f32 %v1033_v45, %v1032_v42  ;;  %v1035_v48 = vpop.f32.mrb[14].mxu1  ;;  %v996_v49 = vpop.f32.mrb[15].mxu0  ;;  %v564_v59 = vsel %vm507_vm0, %v546_v52, 0.0 }
 0x112   :  { %v997_v53 = vadd.f32 %v996_v49, %v995_v46  ;;  %v1036_v54 = vpop.f32.mrb[15].mxu1  ;;  %524 = vadd.xlane.f32.xlu1 %v523_v50  ;;  %562 = vadd.xlane.f32.xlu0 %v561_v51 }
 0x113   :  { %v1392_v55 = vadd.f32 %v1034_v47, %v994_v44  ;;  %v1037_v56 = vadd.f32 %v1036_v54, %v1035_v48  ;;  %v605_v44 = vld [vmem:[%s1562_s2] sm:$0xff] }
 0x115   :  { %v1394_v57 = vadd.f32 %v1037_v56, %v997_v53  ;;  %v526_v58 = vsel %vm507_vm0, %v1392_v55, 0.0  ;;  %v547_v61 = vmul.f32 %v1392_v55, %v1392_v55 }
 0x116   :  { %527 = vadd.xlane.f32.xlu1 %v526_v58  ;;  %565 = vadd.xlane.f32.xlu0 %v564_v59 }
 0x117   :  { %v529_v63 = vsel %vm507_vm0, %v1394_v57, 0.0  ;;  %v567_v0 = vsel %vm507_vm0, %v547_v61, 0.0  ;;  %v548_v1 = vmul.f32 %v1394_v57, %v1394_v57 }
 0x119   :  { %v570_v2 = vsel %vm507_vm0, %v548_v1, 0.0  ;;  %v606_v1 = vld [vmem:[%s1562_s2 + $0x8] sm:$0xff] }
 0x11a   :  { %530 = vadd.xlane.f32.xlu1 %v529_v63  ;;  %568 = vadd.xlane.f32.xlu0 %v567_v0 }
 0x11e   :  { %571 = vadd.xlane.f32.xlu1 %v570_v2 }
 0x12f   :  { %703 = vperm.xlu1 %1065, %v693_v3  }
 0x133   :  { %708 = vperm.xlu1 %1065, %v694_v4  }
 0x137   :  { %713 = vperm.xlu1 %1065, %v695_v5  }
 0x13b   :  { %718 = vperm.xlu1 %1065, %v696_v6  }
 0x13f   :  { %723 = vperm.xlu1 %1065, %v697_v7  }
 0x18b   :  { %v510_v8 = vpop.xlane.xlu0 %509 }
 0x18c   :  { %v1422_v9 = vmul.f32 0.03125, %v510_v8 }
 0x18d   :  { %v551_v10 = vpop.xlane.xlu1 %550 }
 0x18e   :  { %v581_v11 = vmul.f32 %v1422_v9, %v1422_v9  ;;  %v573_v12 = vmul.f32 0.03125, %v551_v10 }
 0x18f   :  { %v513_v13 = vpop.xlane.xlu0 %512 }
 0x190   :  { %v589_v14 = vsub.f32 %v573_v12, %v581_v11  ;;  %v1426_v16 = vmul.f32 0.03125, %v513_v13  ;;  %v607_v13 = vld [vmem:[%s1562_s2 + $0x10] sm:$0xff] }
 0x192   :  { %v597_v18 = vmax.f32 %v589_v14, 0.0  ;;  %v582_v22 = vmul.f32 %v1426_v16, %v1426_v16 }
 0x193   :  { %v516_v19 = vpop.xlane.xlu1 %515  ;;  %v554_v20 = vpop.xlane.xlu0 %553 }
 0x194   :  { %v613_v21 = vadd.f32 1e-05, %v597_v18  ;;  %v1430_v23 = vmul.f32 0.03125, %v516_v19  ;;  %v574_v24 = vmul.f32 0.03125, %v554_v20 }
 0x196   :  { %1123 = vrsqrt.f32 %v613_v21  ;;  %v590_v25 = vsub.f32 %v574_v24, %v582_v22  ;;  %v583_v28 = vmul.f32 %v1430_v23, %v1430_v23 }
 0x197   :  { %v519_v26 = vpop.xlane.xlu1 %518  ;;  %v557_v27 = vpop.xlane.xlu0 %556 }
 0x198   :  { %v598_v29 = vmax.f32 %v590_v25, 0.0  ;;  %v1434_v30 = vmul.f32 0.03125, %v519_v26  ;;  %v575_v31 = vmul.f32 0.03125, %v557_v27  ;;  %v608_v26 = vld [vmem:[%s1562_s2 + $0x18] sm:$0xff] }
 0x19a   :  { %v614_v32 = vadd.f32 1e-05, %v598_v29  ;;  %v591_v33 = vsub.f32 %v575_v31, %v583_v28  ;;  %v584_v34 = vmul.f32 %v1434_v30, %v1434_v30 }
 0x19b   :  { %v522_v36 = vpop.xlane.xlu1 %521  ;;  %v560_v38 = vpop.xlane.xlu0 %559 }
 0x19c   :  { %1125 = vrsqrt.f32 %v614_v32  ;;  %v599_v39 = vmax.f32 %v591_v33, 0.0  ;;  %v1438_v40 = vmul.f32 0.03125, %v522_v36  ;;  %v576_v41 = vmul.f32 0.03125, %v560_v38  ;;  %v609_v33 = vld [vmem:[%s1562_s2 + $0x20] sm:$0xff] }
 0x19e   :  { %v615_v42 = vadd.f32 1e-05, %v599_v39  ;;  %v592_v43 = vsub.f32 %v576_v41, %v584_v34  ;;  %v585_v45 = vmul.f32 %v1438_v40, %v1438_v40  ;;  %v610_v39 = vld [vmem:[%s1562_s2 + $0x28] sm:$0xff] }
 0x19f   :  { %v525_v46 = vpop.xlane.xlu1 %524  ;;  %v563_v47 = vpop.xlane.xlu0 %562 }
 0x1a0   :  { %v1124_v48 = vpop.eup %1123  ;;  %1127 = vrsqrt.f32 %v615_v42  ;;  %v600_v49 = vmax.f32 %v592_v43, 0.0  ;;  %v1445_v50 = vmul.f32 0.03125, %v525_v46  ;;  %v577_v51 = vmul.f32 0.03125, %v563_v47  ;;  %v698_v42 = vld [vmem:[%s1563_s3 + $0x28] sm:$0xff]  ;;  %v699_v46 = vld [vmem:[%s1563_s3 + $0x30] sm:$0xff] }
 0x1a1   :  { %v629_v52 = vmul.f32 %v1124_v48, %v605_v44  ;;  %v611_v44 = vld [vmem:[%s1562_s2 + $0x30] sm:$0xff]  ;;  %v612_v48 = vld [vmem:[%s1562_s2 + $0x38] sm:$0xff] }
 0x1a2   :  { %v616_v53 = vadd.f32 1e-05, %v600_v49  ;;  %v593_v54 = vsub.f32 %v577_v51, %v585_v45  ;;  %v586_v56 = vmul.f32 %v1445_v50, %v1445_v50 }
 0x1a3   :  { %v528_v58 = vpop.xlane.xlu1 %527  ;;  %647 = vperm.xlu0 %1066, %v629_v52   ;;  %v566_v59 = vpop.xlane.xlu0 %565  ;;  %v700_v52 = vld [vmem:[%s1563_s3 + $0x38] sm:$0xff] }
 0x1a4   :  { %1129 = vrsqrt.f32 %v616_v53  ;;  %v601_v61 = vmax.f32 %v593_v54, 0.0  ;;  %v1449_v63 = vmul.f32 0.03125, %v528_v58  ;;  %v578_v0 = vmul.f32 0.03125, %v566_v59  ;;  %v810_v53 = vld [vmem:[%s1565_s5] sm:$0xff]  ;;  %v811_v54 = vld [vmem:[%s1565_s5 + $0x8] sm:$0xff]  ;;  %v812_v59 = vld [vmem:[%s1565_s5 + $0x10] sm:$0xff] }
 0x1a5   :  { %v1055_v58 = vpack.c.bf16 %v811_v54, %v810_v53 }
 0x1a6   :  { %v1126_v2 = vpop.eup %1125  ;;  %v617_v3 = vadd.f32 1e-05, %v601_v61  ;;  %v594_v4 = vsub.f32 %v578_v0, %v586_v56  ;;  %v587_v5 = vmul.f32 %v1449_v63, %v1449_v63  ;;  %v1168_v56 = vmov 0.0|0.0   ;;  %v813_v61 = vld [vmem:[%s1565_s5 + $0x18] sm:$0xff] }
 0x1a7   :  { %v531_v6 = vpop.xlane.xlu1 %530  ;;  %v569_v7 = vpop.xlane.xlu0 %568  ;;  %v630_v8 = vmul.f32 %v1126_v2, %v606_v1  ;;  %1054 = vmatprep.subr.bf16.mxu0 %v1168_v56  ;;  %v1058_v0 = vpack.c.bf16 %v813_v61, %v812_v59  ;;  %v1170_v1 = vmov 0.0  }
 0x1a8   :  { %1131 = vrsqrt.f32 %v617_v3  ;;  %v602_v10 = vmax.f32 %v594_v4, 0.0  ;;  %v1456_v11 = vmul.f32 0.03125, %v531_v6  ;;  %v579_v12 = vmul.f32 0.03125, %v569_v7  ;;  %1056 = vmatpush3.bf16.msra.mxu0 %v1055_v58  ;;  %1051 = vmatprep.mubr.msk.f32.mxu0 %vm1169_vm1, %v1170_v1 }
 0x1a9   :  { %652 = vperm.xlu1 %1065, %v630_v8   ;;  %1057 = vmatprep.subr.bf16.mxu0 %v1168_v56  ;;  %v637_v6 = vsub.f32 %v1351_v60, %v1422_v9  ;;  %v639_v60 = vsub.f32 %v1364_v15, %v1430_v23  ;;  %v775_v15 = vld [vmem:[%s1564_s4 + $0x10] sm:$0xff] }
 0x1aa   :  { %v1128_v14 = vpop.eup %1127  ;;  %v618_v18 = vadd.f32 1e-05, %v602_v10  ;;  %v595_v19 = vsub.f32 %v579_v12, %v587_v5  ;;  %v588_v22 = vmul.f32 %v1456_v11, %v1456_v11 }
 0x1ab   :  { %v572_v20 = vpop.xlane.xlu1 %571  ;;  %v631_v21 = vmul.f32 %v1128_v14, %v607_v13  ;;  %v638_v14 = vsub.f32 %v1353_v62, %v1426_v16 }
 0x1ac   :  { %1133 = vrsqrt.f32 %v618_v18  ;;  %v603_v24 = vmax.f32 %v595_v19, 0.0  ;;  %v580_v25 = vmul.f32 0.03125, %v572_v20  ;;  %1059 = vmatpush3.bf16.msra.mxu0 %v1058_v0  ;;  %v773_v20 = vld [vmem:[%s1564_s4] sm:$0xff]  ;;  %v643_v0 = vsub.f32 %v1392_v55, %v1449_v63  ;;  %v779_v55 = vld [vmem:[%s1564_s4 + $0x30] sm:$0xff] }
 0x1ad   :  { %657 = vperm.xlu1 %1065, %v631_v21  }
 0x1ae   :  { %v1130_v27 = vpop.eup %1129  ;;  %v619_v28 = vadd.f32 1e-05, %v603_v24  ;;  %v596_v29 = vsub.f32 %v580_v25, %v588_v22  ;;  %v774_v24 = vld [vmem:[%s1564_s4 + $0x8] sm:$0xff] }
 0x1af   :  { %v632_v31 = vmul.f32 %v1130_v27, %v608_v26  ;;  %v704_v2 = vpop.permute.xlu1 %703 }
 0x1b0   :  { %1135 = vrsqrt.f32 %v619_v28  ;;  %v604_v32 = vmax.f32 %v596_v29, 0.0  ;;  %v640_v28 = vsub.f32 %v1366_v17, %v1434_v30 }
 0x1b1   :  { %662 = vperm.xlu1 %1065, %v632_v31  }
 0x1b2   :  { %v1132_v34 = vpop.eup %1131  ;;  %v620_v36 = vadd.f32 1e-05, %v604_v32 }
 0x1b3   :  { %v633_v38 = vmul.f32 %v1132_v34, %v609_v33  ;;  %v709_v3 = vpop.permute.xlu1 %708 }
 0x1b4   :  { %1137 = vrsqrt.f32 %v620_v36 }
 0x1b5   :  { %667 = vperm.xlu1 %1065, %v633_v38  }
 0x1b6   :  { %v1134_v41 = vpop.eup %1133 }
 0x1b7   :  { %v634_v43 = vmul.f32 %v1134_v41, %v610_v39  ;;  %v714_v4 = vpop.permute.xlu1 %713  ;;  %v641_v41 = vsub.f32 %v1378_v35, %v1438_v40  ;;  %v777_v40 = vld [vmem:[%s1564_s4 + $0x20] sm:$0xff] }
 0x1b9   :  { %728 = vperm.xlu1 %1065, %v698_v42   ;;  %672 = vperm.xlu0 %1066, %v634_v43   ;;  %v776_v42 = vld [vmem:[%s1564_s4 + $0x18] sm:$0xff] }
 0x1ba   :  { %v1136_v45 = vpop.eup %1135 }
 0x1bb   :  { %v635_v47 = vmul.f32 %v1136_v45, %v611_v44  ;;  %v719_v5 = vpop.permute.xlu1 %718 }
 0x1bd   :  { %733 = vperm.xlu1 %1065, %v699_v46   ;;  %677 = vperm.xlu0 %1066, %v635_v47  }
 0x1be   :  { %v1138_v49 = vpop.eup %1137 }
 0x1bf   :  { %v636_v51 = vmul.f32 %v1138_v49, %v612_v48  ;;  %v724_v10 = vpop.permute.xlu1 %723  ;;  %v642_v49 = vsub.f32 %v1380_v37, %v1445_v50  ;;  %v778_v50 = vld [vmem:[%s1564_s4 + $0x28] sm:$0xff] }
 0x1c1   :  { %682 = vperm.xlu0 %1066, %v636_v51  }
 0x1c5   :  { %738 = vperm.xlu0 %1066, %v700_v52  }
 0x222   :  { %v648_v7 = vpop.permute.xlu0 %647 }
 0x223   :  { %v685_v8 = vmul.f32 %v648_v7, %v637_v6 }
 0x225   :  { %v741_v12 = vadd.f32 %v704_v2, %v685_v8 }
 0x227   :  { %v757_v13 = vmul.f32 0.2, %v741_v12  ;;  %vm749_vm2 = vcmp.gt.f32.partialorder %v741_v12, 0.0 }
 0x228   :  { %v653_v18 = vpop.permute.xlu1 %652 }
 0x229   :  { %v686_v19 = vmul.f32 %v653_v18, %v638_v14  ;;  %v765_v21 = vsel %vm749_vm2, %v741_v12, %v757_v13  ;;  %v644_v13 = vsub.f32 %v1394_v57, %v1456_v11 }
 0x22a   :  { %v781_v16 = vmul.f32 %v773_v20, %v765_v21 }
 0x22b   :  { %v742_v22 = vadd.f32 %v709_v3, %v686_v19 }
 0x22c   :  { %v658_v9 = vpop.permute.xlu1 %657  ;;  %v789_v33 = vsel %vm507_vm0, %v781_v16, 0.0 }
 0x22d   :  { %vm750_vm3 = vcmp.gt.f32.partialorder %v742_v22, 0.0  ;;  %v758_v25 = vmul.f32 0.2, %v742_v22  ;;  %v687_v62 = vmul.f32 %v658_v9, %v639_v60 }
 0x22f   :  { %v766_v26 = vsel %vm750_vm3, %v742_v22, %v758_v25  ;;  %v743_v27 = vadd.f32 %v714_v4, %v687_v62 }
 0x230   :  { %v782_v29 = vmul.f32 %v774_v24, %v766_v26  ;;  %v663_v31 = vpop.permute.xlu1 %662  ;;  %v780_v24 = vld [vmem:[%s1564_s4 + $0x38] sm:$0xff]  ;;  %s1171_s4 = smov [#allocation2]  }
 0x231   :  { %vm751_vm4 = vcmp.gt.f32.partialorder %v743_v27, 0.0  ;;  %v759_v23 = vmul.f32 0.2, %v743_v27  ;;  %v688_v32 = vmul.f32 %v663_v31, %v640_v28  ;;  %s901_s20 = sshll.u32 %s1171_s4, 4  ;;  %s902_s20 = int_to_ptr.vmem [resolvable:$true] %s901_s20 }
 0x232   :  { %v790_v34 = vsel %vm507_vm0, %v782_v29, 0.0  ;;  %s1143_s1 = scalar_lea.vmem %s902_s20, 16  ;;  %s1147_s21 = scalar_lea.vmem %s902_s20, 32 }
 0x233   :  { %v791_v36 = vadd.f32 %v790_v34, %v789_v33  ;;  %v767_v38 = vsel %vm751_vm4, %v743_v27, %v759_v23  ;;  %v744_v39 = vadd.f32 %v719_v5, %v688_v32  ;;  %p1144_p0 = scmp.ne.s32.totalorder %s902_s20, %s1143_s1  ;;  %p1148_p1 = scmp.lt.s32.totalorder %s902_s20, %s902_s20 }
 0x234   :  { %v783_v17 = vmul.f32 %v775_v15, %v767_v38  ;;  %v668_v30 = vpop.permute.xlu1 %667  ;;  %p1149_p2 = scmp.lt.s32.totalorder %s1147_s21, %s1143_s1 }
 0x235   :  { %vm752_vm5 = vcmp.gt.f32.partialorder %v744_v39, 0.0  ;;  %v760_v43 = vmul.f32 0.2, %v744_v39  ;;  %v689_v44 = vmul.f32 %v668_v30, %v641_v41 }
 0x236   :  { %v792_v45 = vsel %vm507_vm0, %v783_v17, 0.0  ;;  %p1150_p3 = por %p1149_p2, %p1148_p1 }
 0x237   :  { %v793_v46 = vadd.f32 %v792_v45, %v791_v36  ;;  %v768_v47 = vsel %vm752_vm5, %v744_v39, %v760_v43  ;;  %v745_v48 = vadd.f32 %v724_v10, %v689_v44 }
 0x238   :  { %v784_v51 = vmul.f32 %v776_v42, %v768_v47  ;;  %v729_v52 = vpop.permute.xlu1 %728  ;;  %v673_v35 = vpop.permute.xlu0 %672  ;;  %p1151_p4 = pnand %p1150_p3, %p1144_p0 }
 0x239   :  { %vm753_vm6 = vcmp.gt.f32.partialorder %v745_v48, 0.0  ;;  %v761_v53 = vmul.f32 0.2, %v745_v48  ;;  %v690_v54 = vmul.f32 %v673_v35, %v642_v49 }
 0x23a   :  { %v794_v56 = vsel %vm507_vm0, %v784_v51, 0.0 }
 0x23b   :  { %v795_v58 = vadd.f32 %v794_v56, %v793_v46  ;;  %v769_v59 = vsel %vm753_vm6, %v745_v48, %v761_v53  ;;  %v746_v61 = vadd.f32 %v729_v52, %v690_v54 }
 0x23c   :  { %v785_v1 = vmul.f32 %v777_v40, %v769_v59  ;;  %v678_v37 = vpop.permute.xlu0 %677  ;;  %v734_v5 = vpop.permute.xlu1 %733 }
 0x23d   :  { %vm754_vm7 = vcmp.gt.f32.partialorder %v746_v61, 0.0  ;;  %v762_v2 = vmul.f32 0.2, %v746_v61  ;;  %v691_v3 = vmul.f32 %v678_v37, %v643_v0 }
 0x23e   :  { %v796_v4 = vsel %vm507_vm0, %v785_v1, 0.0 }
 0x23f   :  { %v797_v6 = vadd.f32 %v796_v4, %v795_v58  ;;  %v770_v7 = vsel %vm754_vm7, %v746_v61, %v762_v2  ;;  %v747_v8 = vadd.f32 %v734_v5, %v691_v3 }
 0x240   :  { %v786_v10 = vmul.f32 %v778_v50, %v770_v7  ;;  %v683_v12 = vpop.permute.xlu0 %682 }
 0x241   :  { %vm755_vm8 = vcmp.gt.f32.partialorder %v747_v8, 0.0  ;;  %v763_v63 = vmul.f32 0.2, %v747_v8  ;;  %v692_v20 = vmul.f32 %v683_v12, %v644_v13 }
 0x242   :  { %v798_v14 = vsel %vm507_vm0, %v786_v10, 0.0 }
 0x243   :  { %v799_v18 = vadd.f32 %v798_v14, %v797_v6  ;;  %v771_v19 = vsel %vm755_vm8, %v747_v8, %v763_v63 }
 0x244   :  { %v787_v21 = vmul.f32 %v779_v55, %v771_v19  ;;  %v739_v22 = vpop.permute.xlu0 %738 }
 0x245   :  { %v748_v60 = vadd.f32 %v739_v22, %v692_v20 }
 0x246   :  { %v800_v9 = vsel %vm507_vm0, %v787_v21, 0.0 }
 0x247   :  { %v801_v25 = vadd.f32 %v800_v9, %v799_v18  ;;  %vm756_vm9 = vcmp.gt.f32.partialorder %v748_v60, 0.0  ;;  %v764_v62 = vmul.f32 0.2, %v748_v60 }
 0x249   :  { %v772_v16 = vsel %vm756_vm9, %v748_v60, %v764_v62 }
 0x24a   :  { %v788_v26 = vmul.f32 %v780_v24, %v772_v16 }
 0x24c   :  { %v802_v57 = vsel %vm507_vm0, %v788_v26, 0.0 }
 0x24d   :  { %v803_v11 = vadd.f32 %v802_v57, %v801_v25 }
 0x24f   :  { %v804_v27 = vrot.slane %v803_v11, 4 }
 0x251   :  { %v805_v28 = vadd.f32 %v804_v27, %v803_v11 }
 0x253   :  { %v806_v29 = vrot.slane %v805_v28, 2 }
 0x255   :  { %v807_v31 = vadd.f32 %v806_v29, %v805_v28 }
 0x257   :  { %v808_v15 = vrot.slane %v807_v31, 1 }
 0x259   :  { %v809_v23 = vadd.f32 %v808_v15, %v807_v31 }
 0x25b   :  { %1052 = vmatmul.mubr.msk.f32.vlgmr.msra.gmra.mrb[16].mxu0 %vm507_vm0, %v809_v23 }
 0x32e   :  { %v883_v32 = vpop.f32.mrb[16].mxu0 }
 0x32f   :  { %v887_v33 = vsub.f32 0.0, %v883_v32  ;;  %v1053_v34 = vpop.f32.mrb[17].mxu0 }
 0x331   :  { %v888_v36 = vmul.f32 1.442695, %v887_v33 }
 0x333   :  { %1139 = vpow2.f32 %v888_v36 }
 0x33d   :  { %v1140_v38 = vpop.eup %1139 }
 0x33e   :  { %v890_v39 = vadd.f32 1.0, %v1140_v38 }
 0x340   :  { %1141 = vrcp.f32 %v890_v39 }
 0x34a   :  { %v1142_v41 = vpop.eup %1141 }
 0x34b   :  { %894 = vst.msk [vmem:[#allocation2] sm:$0x1] %vm893_vm10, %v1142_v41 }
 0x34c   :  { %1154 = shalt.err (!%p1151_p4)
}
 0x34d   :  { %s1155_s24 = scalar_lea.hbm %s1566_s6, 16 }
 0x34e   :  { %p1156_p5 = scmp.ne.s32.totalorder %s1566_s6, %s1155_s24  ;;  %p1159_p6 = scmp.lt.u32.totalorder %s1155_s24, %s1566_s6 }
 0x350   :  { %p1161_p7 = pnand %p1159_p6, %p1156_p5 }
 0x352   :  { %1164 = shalt.err (!%p1161_p7)
}
 0x353   :  { %904 = dma.vmem_to_hbm [thread:$0]  %s902_s20, 16, %s1566_s6, [#allocation3]  }
 0x354   :  { %1165 = dma.done.wait [#allocation3], 16  }
 0x355   :  { %1166 = vsyncadd [#allocation3], 4294967280 }
 0x356   :  { %908 = vsyncpa [#allocation3], 1 }

</bundles_post_ra>
